<compile_context>
chip_gen: v7x
topology: tpu7x:2x2x1
jax: 0.10.0
libtpu: 0.0.40
codegen_flags: <defaults>
</compile_context>

<pallas_src>
import functools
import math

import jax
import jax.numpy as jnp
from jax.experimental import pallas as pl
from jax.experimental.pallas import tpu as pltpu

_NEG_INF = float(-1e30)


def _flash_attn_kernel(qtab_ref, ktab_ref, q_ref, k_ref, v_ref, o_ref,
                       qs_ref, m_ref, l_ref, acc_ref, *, scale, tq, tkv):
    """One lower-triangular (qi, ki) flash-attention step.

    Grid = (batch_tiles, heads, n_tri); the last ("arbitrary") axis walks the
    lower triangle of (q_block, kv_block) pairs via the scalar-prefetched
    qtab/ktab tables, so fully-masked blocks never become grid steps.

    q/k/v_ref : (BT, tq|tkv, Dh)  input dtype (bf16 recommended)
    o_ref     : (BT, tq, Dh)      written on the diagonal (last) step of a run
    qs_ref    : (BT, tq, Dh)      scale*q staged once per q block
    m/l_ref   : (BT, tq, 1)       f32 running max / denominator
    acc_ref   : (BT, tq, Dh)      f32 output accumulator
    """
    t = pl.program_id(2)
    qi = qtab_ref[t]
    ki = ktab_ref[t]

    @pl.when(ki == 0)
    def _init():
        # Stage scale*q once per q-block run (q_ref is revisited across it),
        # so the tq*Dh multiply is not repeated on every kv step.
        qs_ref[...] = (q_ref[...] * scale).astype(qs_ref.dtype)
        m_ref[...] = jnp.full_like(m_ref, _NEG_INF)
        l_ref[...] = jnp.zeros_like(l_ref)
        acc_ref[...] = jnp.zeros_like(acc_ref)

    def _update(apply_mask):
        q = qs_ref[...]
        k = k_ref[...]
        v = v_ref[...]
        # Contraction over the last dims -> no explicit K transpose (XLU).
        s = jnp.einsum('bqd,bkd->bqk', q, k,
                       preferred_element_type=jnp.float32)
        if apply_mask:
            # Diagonal block: tq == tkv and q_lo == k_lo, so the causal mask is
            # the *static* lower triangle; 2-D iota broadcast over the batch
            # dim (cuts iota/compare VPU work by the batch-tile factor).
            row = jax.lax.broadcasted_iota(jnp.int32, (tq, tkv), 0)
            col = jax.lax.broadcasted_iota(jnp.int32, (tq, tkv), 1)
            s = jnp.where((col <= row)[None, :, :], s, jnp.float32(_NEG_INF))

        m_prev = m_ref[...]
        m_new = jnp.maximum(m_prev, jnp.max(s, axis=-1, keepdims=True))
        alpha = jnp.exp(m_prev - m_new)
        # TODO(synk): on v6e/v7x a bf16 exp here would roughly double EUP rate;
        #             kept in f32 pending an accuracy sweep (and v5e has no
        #             bf16 EUP).
        p = jnp.exp(s - m_new)
        l_ref[...] = alpha * l_ref[...] + jnp.sum(p, axis=-1, keepdims=True)
        acc_ref[...] = alpha * acc_ref[...] + jnp.einsum(
            'bqk,bkd->bqd', p.astype(v.dtype), v,
            preferred_element_type=jnp.float32)
        m_ref[...] = m_new

    # Interior blocks (strictly below the diagonal): fully visible, no mask.
    @pl.when(ki < qi)
    def _interior():
        _update(apply_mask=False)

    # Diagonal block: masked update, then normalize + store (last step of run).
    @pl.when(ki == qi)
    def _diag_finalize():
        _update(apply_mask=True)
        inv = pl.reciprocal(l_ref[...], approx=True)   # EUP slot, ~free
        o_ref[...] = (acc_ref[...] * inv).astype(o_ref.dtype)


def _pick_seq_tile(t, target=256):
    """Largest divisor of t that is <= target and a multiple of 8, else t."""
    if t <= target:
        return t
    for c in range(target, 7, -1):
        if t % c == 0 and c % 8 == 0:
            return c
    return t  # full extent is always a legal block


def _pick_batch_tile(n, cap, other_parallel=1):
    """Largest divisor of n <= cap, keeping >= 2 units of parallel grid work
    (v7x megacore) whenever a smaller divisor makes that possible."""
    divisors = [d for d in range(1, min(n, cap) + 1) if n % d == 0]
    best = max(divisors)
    if (n // best) * other_parallel >= 2:
        return best
    ok = [d for d in divisors if (n // d) * other_parallel >= 2]
    return max(ok) if ok else best


def _triangular_tables(n_q):
    """(qi, ki) index tables enumerating the lower triangle, ki inner."""
    qs, ks = [], []
    for q in range(n_q):
        for k in range(q + 1):
            qs.append(q)
            ks.append(k)
    return jnp.asarray(qs, jnp.int32), jnp.asarray(ks, jnp.int32)


def _attn_pallas_call(kernel, grid, in_specs, out_spec, out_shape,
                      scratch_shapes):
    return pl.pallas_call(
        kernel,
        out_shape=out_shape,
        grid_spec=pltpu.PrefetchScalarGridSpec(
            num_scalar_prefetch=2,          # qtab, ktab -> SMEM
            grid=grid,
            in_specs=in_specs,
            out_specs=out_spec,
            scratch_shapes=scratch_shapes,
        ),
        compiler_params=pltpu.CompilerParams(
            # batch / head axes parallel (sharded across TCs on v7x); the
            # triangular (q,kv) axis is sequential and carries the scratch.
            dimension_semantics=("parallel", "parallel", "arbitrary"),
            # Sized against v7x's 64 MiB VMEM; ample headroom on v5e/v6e too.
            vmem_limit_bytes=32 * 1024 * 1024,
        ),
    )


def pallas_causal_attention_packed(qkv, num_heads, head_dim):
    """Causal self-attention directly on the packed (B, T, 3C) QKV tensor.

    Requires head_dim % 128 == 0 (lane-dense dh slabs).  No head split/merge
    transposes: each grid step addresses a dh-wide slab of q / k / v inside the
    packed last dim, and the output is written straight back in (B, T, C).
    """
    b, t, three_c = qkv.shape
    h, dh = num_heads, head_dim
    c = h * dh
    assert three_c == 3 * c and dh % 128 == 0
    scale = 1.0 / math.sqrt(dh)

    tq = _pick_seq_tile(t)
    n_q = t // tq
    qtab, ktab = _triangular_tables(n_q)
    b_tile = _pick_batch_tile(b, 4, other_parallel=h)
    grid = (b // b_tile, h, int(qtab.shape[0]))

    blk = (b_tile, tq, dh)
    q_spec = pl.BlockSpec(blk, lambda bi, hi, ti, qt, kt: (bi, qt[ti], hi))
    k_spec = pl.BlockSpec(blk, lambda bi, hi, ti, qt, kt: (bi, kt[ti], h + hi))
    v_spec = pl.BlockSpec(blk, lambda bi, hi, ti, qt, kt: (bi, kt[ti], 2 * h + hi))
    o_spec = pl.BlockSpec(blk, lambda bi, hi, ti, qt, kt: (bi, qt[ti], hi))

    kernel = functools.partial(_flash_attn_kernel, scale=scale, tq=tq, tkv=tq)
    call = _attn_pallas_call(
        kernel, grid, [q_spec, k_spec, v_spec], o_spec,
        jax.ShapeDtypeStruct((b, t, c), qkv.dtype),
        [
            pltpu.VMEM((b_tile, tq, dh), qkv.dtype),    # scale * q (staged)
            pltpu.VMEM((b_tile, tq, 1), jnp.float32),   # running max
            pltpu.VMEM((b_tile, tq, 1), jnp.float32),   # running denominator
            pltpu.VMEM((b_tile, tq, dh), jnp.float32),  # accumulator
        ])
    # The same packed array feeds q, k and v (different last-dim slabs).
    return call(qtab, ktab, qkv, qkv, qkv)


def pallas_causal_attention_heads(q, k, v):
    """Fallback for head_dim % 128 != 0: q/k/v as (B*H, T, Dh)."""
    bh, t, dh = q.shape
    scale = 1.0 / math.sqrt(dh)

    tq = _pick_seq_tile(t)
    n_q = t // tq
    qtab, ktab = _triangular_tables(n_q)
    bh_tile = _pick_batch_tile(bh, 4, other_parallel=1)
    grid = (bh // bh_tile, 1, int(qtab.shape[0]))   # dummy head axis

    blk = (bh_tile, tq, dh)
    q_spec = pl.BlockSpec(blk, lambda gi, hi, ti, qt, kt: (gi, qt[ti], 0))
    kv_spec = pl.BlockSpec(blk, lambda gi, hi, ti, qt, kt: (gi, kt[ti], 0))
    o_spec = pl.BlockSpec(blk, lambda gi, hi, ti, qt, kt: (gi, qt[ti], 0))

    kernel = functools.partial(_flash_attn_kernel, scale=scale, tq=tq, tkv=tq)
    call = _attn_pallas_call(
        kernel, grid, [q_spec, kv_spec, kv_spec], o_spec,
        jax.ShapeDtypeStruct((bh, t, dh), q.dtype),
        [
            pltpu.VMEM((bh_tile, tq, dh), q.dtype),
            pltpu.VMEM((bh_tile, tq, 1), jnp.float32),
            pltpu.VMEM((bh_tile, tq, 1), jnp.float32),
            pltpu.VMEM((bh_tile, tq, dh), jnp.float32),
        ])
    return call(qtab, ktab, q, k, v)


class AttentionParams:
    """Deterministically-initialized weights for the attention block."""

    def __init__(self, key, embed_dim, num_heads):
        assert embed_dim % num_heads == 0
        self.embed_dim = embed_dim
        self.num_heads = num_heads
        self.head_dim = embed_dim // num_heads
        k1, k2, k3, k4 = jax.random.split(key, 4)
        s = 0.02
        self.w_qkv = s * jax.random.normal(k1, (embed_dim, 3 * embed_dim), jnp.float32)
        self.b_qkv = s * jax.random.normal(k2, (3 * embed_dim,), jnp.float32)
        self.w_proj = s * jax.random.normal(k3, (embed_dim, embed_dim), jnp.float32)
        self.b_proj = s * jax.random.normal(k4, (embed_dim,), jnp.float32)


def attention_forward(params, x, kv_cache=None, valid_ctx_len=None,
                      freqs_cis=None, compute_dtype=jnp.bfloat16):
    """forward(x, kv_cache, valid_ctx_len, freqs_cis) -> (B, T, C)."""
    # TODO(synk): kv_cache / valid_ctx_len / freqs_cis have no concrete
    #             semantics in the base class; incremental decode and RoPE
    #             are not implemented.
    del kv_cache, valid_ctx_len, freqs_cis
    b, t, c = x.shape
    h, dh = params.num_heads, params.head_dim

    # QKV projection (glue, plain JAX, f32 accumulate), cast to compute dtype.
    qkv = (x @ params.w_qkv + params.b_qkv).astype(compute_dtype)   # (B, T, 3C)

    if dh % 128 == 0:
        # Transpose-free path: kernel indexes dh-wide slabs of the packed QKV
        # and writes the output directly in (B, T, C) layout.
        o = pallas_causal_attention_packed(qkv, h, dh)              # (B, T, C)
    else:
        # TODO(synk): lane-sparse head dims (Dh % 128 != 0) pay the head
        #             split/merge transposes and underfill MXU lanes.
        q, k, v = jnp.split(qkv, 3, axis=-1)

        def to_heads(a):
            return (a.reshape(b, t, h, dh)
                     .transpose(0, 2, 1, 3)
                     .reshape(b * h, t, dh))

        oh = pallas_causal_attention_heads(to_heads(q), to_heads(k), to_heads(v))
        o = (oh.reshape(b, h, t, dh)
               .transpose(0, 2, 1, 3)
               .reshape(b, t, c))

    o = o.astype(x.dtype)
    # output projection (glue, plain JAX)
    return o @ params.w_proj + params.b_proj


def reference_attention(params, x):
    """Pure-JAX f32 reference for correctness checking."""
    b, t, c = x.shape
    h, dh = params.num_heads, params.head_dim
    qkv = x @ params.w_qkv + params.b_qkv
    q, k, v = jnp.split(qkv, 3, axis=-1)
    q = q.reshape(b, t, h, dh).transpose(0, 2, 1, 3)
    k = k.reshape(b, t, h, dh).transpose(0, 2, 1, 3)
    v = v.reshape(b, t, h, dh).transpose(0, 2, 1, 3)
    scores = jnp.einsum("bhqd,bhkd->bhqk", q, k) / math.sqrt(dh)
    mask = jnp.tril(jnp.ones((t, t), bool))
    scores = jnp.where(mask, scores, _NEG_INF)
    p = jax.nn.softmax(scores, axis=-1)
    o = jnp.einsum("bhqk,bhkd->bhqd", p, v)
    o = o.transpose(0, 2, 1, 3).reshape(b, t, c)
    return o @ params.w_proj + params.b_proj


def _rel_err(a, b):
    a = a.astype(jnp.float32)
    b = b.astype(jnp.float32)
    num = jnp.sqrt(jnp.mean((a - b) ** 2))
    den = jnp.sqrt(jnp.mean(b ** 2)) + 1e-12
    return float(num / den)


if __name__ == "__main__":
    key = jax.random.PRNGKey(0)
    keys = jax.random.split(key, 6)

    # --- small demo: tiny shapes, Dh=8 -> heads fallback path ---------------
    B, T, C, H = 2, 8, 32, 4
    params = AttentionParams(keys[0], embed_dim=C, num_heads=H)
    x = jax.random.normal(keys[1], (B, T, C), jnp.float32)
    out = jax.block_until_ready(attention_forward(params, x))
    ref = reference_attention(params, x)
    assert out.shape == (B, T, C)
    assert _rel_err(out, ref) < 3e-2, "mismatch vs reference (small)"

    # --- packed path: Dh=128, T=512 -> triangular multi-block grid, bf16 MXU -
    B2, T2, C2, H2 = 2, 512, 512, 4
    params2 = AttentionParams(keys[2], embed_dim=C2, num_heads=H2)
    x2 = jax.random.normal(keys[3], (B2, T2, C2), jnp.float32)
    out2 = jax.block_until_ready(attention_forward(params2, x2))
    ref2 = reference_attention(params2, x2)
    assert out2.shape == (B2, T2, C2)
    assert _rel_err(out2, ref2) < 3e-2, "mismatch vs reference (packed)"

    # --- heads fallback path with multiple q blocks: Dh=64, T=512 ------------
    B3, T3, C3, H3 = 2, 512, 256, 4
    params3 = AttentionParams(keys[4], embed_dim=C3, num_heads=H3)
    x3 = jax.random.normal(keys[5], (B3, T3, C3), jnp.float32)
    out3 = jax.block_until_ready(attention_forward(params3, x3))
    ref3 = reference_attention(params3, x3)
    assert out3.shape == (B3, T3, C3)
    assert _rel_err(out3, ref3) < 3e-2, "mismatch vs reference (heads)"

    print("KERNEL_OK")
</pallas_src>

<mosaic_0001>
module attributes {stable_mosaic.version = 11 : i64} {
  func.func @_flash_attn_kernel(%arg0: i32, %arg1: i32, %arg2: i32, %arg3: memref<1xi32, #tpu.memory_space<smem>>, %arg4: memref<1xi32, #tpu.memory_space<smem>>, %arg5: memref<4x8x8xbf16, #tpu.memory_space<vmem>>, %arg6: memref<4x8x8xbf16, #tpu.memory_space<vmem>>, %arg7: memref<4x8x8xbf16, #tpu.memory_space<vmem>>, %arg8: memref<4x8x8xbf16, #tpu.memory_space<vmem>>, %arg9: memref<4x8x8xbf16, #tpu.memory_space<vmem>>, %arg10: memref<4x8x1xf32, #tpu.memory_space<vmem>>, %arg11: memref<4x8x1xf32, #tpu.memory_space<vmem>>, %arg12: memref<4x8x8xf32, #tpu.memory_space<vmem>>) attributes {dimension_semantics = [#tpu.dimension_semantics<parallel>, #tpu.dimension_semantics<parallel>, #tpu.dimension_semantics<arbitrary>], iteration_bounds = array<i64: 2, 1, 1>, scalar_prefetch = 2 : i64, scratch_operands = 4 : i64, tpu.core_type = #tpu.core_type<tc>, window_params = [{transform_indices = @transform_0, window_bounds = array<i64: 4, 8, 8>}, {transform_indices = @transform_1, window_bounds = array<i64: 4, 8, 8>}, {transform_indices = @transform_2, window_bounds = array<i64: 4, 8, 8>}, {transform_indices = @transform_3, window_bounds = array<i64: 4, 8, 8>}]} {
    %0 = arith.index_cast %arg2 : i32 to index
    %1 = memref.load %arg3[%0] : memref<1xi32, #tpu.memory_space<smem>>
    %2 = arith.index_cast %arg2 : i32 to index
    %3 = memref.load %arg4[%2] : memref<1xi32, #tpu.memory_space<smem>>
    %c0_i32 = arith.constant 0 : i32
    %4 = arith.cmpi eq, %3, %c0_i32 : i32
    %5 = arith.extui %4 : i1 to i32
    %c0_i32_0 = arith.constant 0 : i32
    %6 = arith.cmpi ne, %5, %c0_i32_0 : i32
    scf.if %6 {
      %c0 = arith.constant 0 : index
      %c0_3 = arith.constant 0 : index
      %c0_4 = arith.constant 0 : index
      %13 = vector.load %arg5[%c0, %c0_3, %c0_4] : memref<4x8x8xbf16, #tpu.memory_space<vmem>>, vector<4x8x8xbf16>
      %cst = arith.constant 3.535160e-01 : bf16
      %14 = vector.broadcast %cst : bf16 to vector<4x8x8xbf16>
      %15 = arith.mulf %13, %14 : vector<4x8x8xbf16>
      %c0_5 = arith.constant 0 : index
      %c0_6 = arith.constant 0 : index
      %c0_7 = arith.constant 0 : index
      %16 = vector.load %arg9[%c0_5, %c0_6, %c0_7] : memref<4x8x8xbf16, #tpu.memory_space<vmem>>, vector<4x8x8xbf16>
      tpu.vector_store %arg9[%c0_5, %c0_6, %c0_7], %15 {strides = array<i32>} : memref<4x8x8xbf16, #tpu.memory_space<vmem>>, vector<4x8x8xbf16>,
      %cst_8 = arith.constant -1.000000e+30 : f32
      %17 = vector.broadcast %cst_8 : f32 to vector<4x8x1xf32>
      %c0_9 = arith.constant 0 : index
      %c0_10 = arith.constant 0 : index
      %c0_11 = arith.constant 0 : index
      %18 = vector.load %arg10[%c0_9, %c0_10, %c0_11] : memref<4x8x1xf32, #tpu.memory_space<vmem>>, vector<4x8x1xf32>
      tpu.vector_store %arg10[%c0_9, %c0_10, %c0_11], %17 {strides = array<i32>} : memref<4x8x1xf32, #tpu.memory_space<vmem>>, vector<4x8x1xf32>,
      %cst_12 = arith.constant 0.000000e+00 : f32
      %19 = vector.broadcast %cst_12 : f32 to vector<4x8x1xf32>
      %c0_13 = arith.constant 0 : index
      %c0_14 = arith.constant 0 : index
      %c0_15 = arith.constant 0 : index
      %20 = vector.load %arg11[%c0_13, %c0_14, %c0_15] : memref<4x8x1xf32, #tpu.memory_space<vmem>>, vector<4x8x1xf32>
      tpu.vector_store %arg11[%c0_13, %c0_14, %c0_15], %19 {strides = array<i32>} : memref<4x8x1xf32, #tpu.memory_space<vmem>>, vector<4x8x1xf32>,
      %cst_16 = arith.constant 0.000000e+00 : f32
      %21 = vector.broadcast %cst_16 : f32 to vector<4x8x8xf32>
      %c0_17 = arith.constant 0 : index
      %c0_18 = arith.constant 0 : index
      %c0_19 = arith.constant 0 : index
      %22 = vector.load %arg12[%c0_17, %c0_18, %c0_19] : memref<4x8x8xf32, #tpu.memory_space<vmem>>, vector<4x8x8xf32>
      tpu.vector_store %arg12[%c0_17, %c0_18, %c0_19], %21 {strides = array<i32>} : memref<4x8x8xf32, #tpu.memory_space<vmem>>, vector<4x8x8xf32>,
    } else {
    }
    %7 = arith.cmpi slt, %3, %1 : i32
    %8 = arith.extui %7 : i1 to i32
    %c0_i32_1 = arith.constant 0 : i32
    %9 = arith.cmpi ne, %8, %c0_i32_1 : i32
    scf.if %9 {
      %c0 = arith.constant 0 : index
      %c0_3 = arith.constant 0 : index
      %c0_4 = arith.constant 0 : index
      %13 = vector.load %arg9[%c0, %c0_3, %c0_4] : memref<4x8x8xbf16, #tpu.memory_space<vmem>>, vector<4x8x8xbf16>
      %c0_5 = arith.constant 0 : index
      %c0_6 = arith.constant 0 : index
      %c0_7 = arith.constant 0 : index
      %14 = vector.load %arg6[%c0_5, %c0_6, %c0_7] : memref<4x8x8xbf16, #tpu.memory_space<vmem>>, vector<4x8x8xbf16>
      %c0_8 = arith.constant 0 : index
      %c0_9 = arith.constant 0 : index
      %c0_10 = arith.constant 0 : index
      %15 = vector.load %arg7[%c0_8, %c0_9, %c0_10] : memref<4x8x8xbf16, #tpu.memory_space<vmem>>, vector<4x8x8xbf16>
      "tpu.trace_start"() <{level = 10 : i32, message = "bqd,bkd->bqk"}> : () -> ()
      %cst = arith.constant dense<0.000000e+00> : vector<4x8x8xf32>
      %16 = tpu.matmul %13, %14, %cst {dimension_numbers = #tpu.dot_dimension_numbers<[2], [2], [1], [1], [0, 0, 0, 1, 1, 1], [0], [0]>} : vector<4x8x8xbf16>, vector<4x8x8xbf16>, vector<4x8x8xf32> -> vector<4x8x8xf32>
      "tpu.trace_stop"() : () -> ()
      %c0_11 = arith.constant 0 : index
      %c0_12 = arith.constant 0 : index
      %c0_13 = arith.constant 0 : index
      %17 = vector.load %arg10[%c0_11, %c0_12, %c0_13] : memref<4x8x1xf32, #tpu.memory_space<vmem>>, vector<4x8x1xf32>
      %cst_14 = arith.constant dense<0xFF800000> : vector<4x8xf32>
      %18 = vector.multi_reduction <maximumf>, %16, %cst_14 [2] : vector<4x8x8xf32> to vector<4x8xf32>
      %19 = vector.shape_cast %18 : vector<4x8xf32> to vector<4x8x1xf32>
      %20 = arith.maximumf %17, %19 : vector<4x8x1xf32>
      %21 = arith.subf %17, %20 : vector<4x8x1xf32>
      %22 = math.exp %21 : vector<4x8x1xf32>
      %23 = vector.broadcast %20 : vector<4x8x1xf32> to vector<4x8x8xf32>
      %24 = arith.subf %16, %23 : vector<4x8x8xf32>
      %25 = math.exp %24 : vector<4x8x8xf32>
      %c0_15 = arith.constant 0 : index
      %c0_16 = arith.constant 0 : index
      %c0_17 = arith.constant 0 : index
      %26 = vector.load %arg11[%c0_15, %c0_16, %c0_17] : memref<4x8x1xf32, #tpu.memory_space<vmem>>, vector<4x8x1xf32>
      %27 = arith.mulf %22, %26 : vector<4x8x1xf32>
      %cst_18 = arith.constant dense<0.000000e+00> : vector<4x8xf32>
      %28 = vector.multi_reduction <add>, %25, %cst_18 [2] : vector<4x8x8xf32> to vector<4x8xf32>
      %29 = vector.shape_cast %28 : vector<4x8xf32> to vector<4x8x1xf32>
      %30 = arith.addf %27, %29 : vector<4x8x1xf32>
      %c0_19 = arith.constant 0 : index
      %c0_20 = arith.constant 0 : index
      %c0_21 = arith.constant 0 : index
      %31 = vector.load %arg11[%c0_19, %c0_20, %c0_21] : memref<4x8x1xf32, #tpu.memory_space<vmem>>, vector<4x8x1xf32>
      tpu.vector_store %arg11[%c0_19, %c0_20, %c0_21], %30 {strides = array<i32>} : memref<4x8x1xf32, #tpu.memory_space<vmem>>, vector<4x8x1xf32>,
      %c0_22 = arith.constant 0 : index
      %c0_23 = arith.constant 0 : index
      %c0_24 = arith.constant 0 : index
      %32 = vector.load %arg12[%c0_22, %c0_23, %c0_24] : memref<4x8x8xf32, #tpu.memory_space<vmem>>, vector<4x8x8xf32>
      %33 = vector.broadcast %22 : vector<4x8x1xf32> to vector<4x8x8xf32>
      %34 = arith.mulf %33, %32 : vector<4x8x8xf32>
      %35 = arith.truncf %25 : vector<4x8x8xf32> to vector<4x8x8xbf16>
      "tpu.trace_start"() <{level = 10 : i32, message = "bqk,bkd->bqd"}> : () -> ()
      %cst_25 = arith.constant dense<0.000000e+00> : vector<4x8x8xf32>
      %36 = tpu.matmul %35, %15, %cst_25 {dimension_numbers = #tpu.dot_dimension_numbers<[2], [1], [1], [2], [0, 0, 0, 1, 1, 2], [0], [0]>} : vector<4x8x8xbf16>, vector<4x8x8xbf16>, vector<4x8x8xf32> -> vector<4x8x8xf32>
      "tpu.trace_stop"() : () -> ()
      %37 = arith.addf %34, %36 : vector<4x8x8xf32>
      %c0_26 = arith.constant 0 : index
      %c0_27 = arith.constant 0 : index
      %c0_28 = arith.constant 0 : index
      %38 = vector.load %arg12[%c0_26, %c0_27, %c0_28] : memref<4x8x8xf32, #tpu.memory_space<vmem>>, vector<4x8x8xf32>
      tpu.vector_store %arg12[%c0_26, %c0_27, %c0_28], %37 {strides = array<i32>} : memref<4x8x8xf32, #tpu.memory_space<vmem>>, vector<4x8x8xf32>,
      %c0_29 = arith.constant 0 : index
      %c0_30 = arith.constant 0 : index
      %c0_31 = arith.constant 0 : index
      %39 = vector.load %arg10[%c0_29, %c0_30, %c0_31] : memref<4x8x1xf32, #tpu.memory_space<vmem>>, vector<4x8x1xf32>
      tpu.vector_store %arg10[%c0_29, %c0_30, %c0_31], %20 {strides = array<i32>} : memref<4x8x1xf32, #tpu.memory_space<vmem>>, vector<4x8x1xf32>,
    } else {
    }
    %10 = arith.cmpi eq, %3, %1 : i32
    %11 = arith.extui %10 : i1 to i32
    %c0_i32_2 = arith.constant 0 : i32
    %12 = arith.cmpi ne, %11, %c0_i32_2 : i32
    scf.if %12 {
      %c0 = arith.constant 0 : index
      %c0_3 = arith.constant 0 : index
      %c0_4 = arith.constant 0 : index
      %13 = vector.load %arg9[%c0, %c0_3, %c0_4] : memref<4x8x8xbf16, #tpu.memory_space<vmem>>, vector<4x8x8xbf16>
      %c0_5 = arith.constant 0 : index
      %c0_6 = arith.constant 0 : index
      %c0_7 = arith.constant 0 : index
      %14 = vector.load %arg6[%c0_5, %c0_6, %c0_7] : memref<4x8x8xbf16, #tpu.memory_space<vmem>>, vector<4x8x8xbf16>
      %c0_8 = arith.constant 0 : index
      %c0_9 = arith.constant 0 : index
      %c0_10 = arith.constant 0 : index
      %15 = vector.load %arg7[%c0_8, %c0_9, %c0_10] : memref<4x8x8xbf16, #tpu.memory_space<vmem>>, vector<4x8x8xbf16>
      "tpu.trace_start"() <{level = 10 : i32, message = "bqd,bkd->bqk"}> : () -> ()
      %cst = arith.constant dense<0.000000e+00> : vector<4x8x8xf32>
      %16 = tpu.matmul %13, %14, %cst {dimension_numbers = #tpu.dot_dimension_numbers<[2], [2], [1], [1], [0, 0, 0, 1, 1, 1], [0], [0]>} : vector<4x8x8xbf16>, vector<4x8x8xbf16>, vector<4x8x8xf32> -> vector<4x8x8xf32>
      "tpu.trace_stop"() : () -> ()
      %17 = tpu.iota {dimensions = array<i32: 0>} : vector<8x8xi32>
      %18 = tpu.iota {dimensions = array<i32: 1>} : vector<8x8xi32>
      %19 = arith.cmpi sle, %18, %17 : vector<8x8xi32>
      %20 = vector.shape_cast %19 : vector<8x8xi1> to vector<1x8x8xi1>
      %cst_11 = arith.constant -1.000000e+30 : f32
      %21 = vector.shape_cast %20 : vector<1x8x8xi1> to vector<1x8x8xi1>
      %22 = vector.broadcast %21 : vector<1x8x8xi1> to vector<4x8x8xi1>
      %23 = vector.broadcast %cst_11 : f32 to vector<4x8x8xf32>
      %24 = arith.select %22, %16, %23 : vector<4x8x8xi1>, vector<4x8x8xf32>
      %c0_12 = arith.constant 0 : index
      %c0_13 = arith.constant 0 : index
      %c0_14 = arith.constant 0 : index
      %25 = vector.load %arg10[%c0_12, %c0_13, %c0_14] : memref<4x8x1xf32, #tpu.memory_space<vmem>>, vector<4x8x1xf32>
      %cst_15 = arith.constant dense<0xFF800000> : vector<4x8xf32>
      %26 = vector.multi_reduction <maximumf>, %24, %cst_15 [2] : vector<4x8x8xf32> to vector<4x8xf32>
      %27 = vector.shape_cast %26 : vector<4x8xf32> to vector<4x8x1xf32>
      %28 = arith.maximumf %25, %27 : vector<4x8x1xf32>
      %29 = arith.subf %25, %28 : vector<4x8x1xf32>
      %30 = math.exp %29 : vector<4x8x1xf32>
      %31 = vector.broadcast %28 : vector<4x8x1xf32> to vector<4x8x8xf32>
      %32 = arith.subf %24, %31 : vector<4x8x8xf32>
      %33 = math.exp %32 : vector<4x8x8xf32>
      %c0_16 = arith.constant 0 : index
      %c0_17 = arith.constant 0 : index
      %c0_18 = arith.constant 0 : index
      %34 = vector.load %arg11[%c0_16, %c0_17, %c0_18] : memref<4x8x1xf32, #tpu.memory_space<vmem>>, vector<4x8x1xf32>
      %35 = arith.mulf %30, %34 : vector<4x8x1xf32>
      %cst_19 = arith.constant dense<0.000000e+00> : vector<4x8xf32>
      %36 = vector.multi_reduction <add>, %33, %cst_19 [2] : vector<4x8x8xf32> to vector<4x8xf32>
      %37 = vector.shape_cast %36 : vector<4x8xf32> to vector<4x8x1xf32>
      %38 = arith.addf %35, %37 : vector<4x8x1xf32>
      %c0_20 = arith.constant 0 : index
      %c0_21 = arith.constant 0 : index
      %c0_22 = arith.constant 0 : index
      %39 = vector.load %arg11[%c0_20, %c0_21, %c0_22] : memref<4x8x1xf32, #tpu.memory_space<vmem>>, vector<4x8x1xf32>
      tpu.vector_store %arg11[%c0_20, %c0_21, %c0_22], %38 {strides = array<i32>} : memref<4x8x1xf32, #tpu.memory_space<vmem>>, vector<4x8x1xf32>,
      %c0_23 = arith.constant 0 : index
      %c0_24 = arith.constant 0 : index
      %c0_25 = arith.constant 0 : index
      %40 = vector.load %arg12[%c0_23, %c0_24, %c0_25] : memref<4x8x8xf32, #tpu.memory_space<vmem>>, vector<4x8x8xf32>
      %41 = vector.broadcast %30 : vector<4x8x1xf32> to vector<4x8x8xf32>
      %42 = arith.mulf %41, %40 : vector<4x8x8xf32>
      %43 = arith.truncf %33 : vector<4x8x8xf32> to vector<4x8x8xbf16>
      "tpu.trace_start"() <{level = 10 : i32, message = "bqk,bkd->bqd"}> : () -> ()
      %cst_26 = arith.constant dense<0.000000e+00> : vector<4x8x8xf32>
      %44 = tpu.matmul %43, %15, %cst_26 {dimension_numbers = #tpu.dot_dimension_numbers<[2], [1], [1], [2], [0, 0, 0, 1, 1, 2], [0], [0]>} : vector<4x8x8xbf16>, vector<4x8x8xbf16>, vector<4x8x8xf32> -> vector<4x8x8xf32>
      "tpu.trace_stop"() : () -> ()
      %45 = arith.addf %42, %44 : vector<4x8x8xf32>
      %c0_27 = arith.constant 0 : index
      %c0_28 = arith.constant 0 : index
      %c0_29 = arith.constant 0 : index
      %46 = vector.load %arg12[%c0_27, %c0_28, %c0_29] : memref<4x8x8xf32, #tpu.memory_space<vmem>>, vector<4x8x8xf32>
      tpu.vector_store %arg12[%c0_27, %c0_28, %c0_29], %45 {strides = array<i32>} : memref<4x8x8xf32, #tpu.memory_space<vmem>>, vector<4x8x8xf32>,
      %c0_30 = arith.constant 0 : index
      %c0_31 = arith.constant 0 : index
      %c0_32 = arith.constant 0 : index
      %47 = vector.load %arg10[%c0_30, %c0_31, %c0_32] : memref<4x8x1xf32, #tpu.memory_space<vmem>>, vector<4x8x1xf32>
      tpu.vector_store %arg10[%c0_30, %c0_31, %c0_32], %28 {strides = array<i32>} : memref<4x8x1xf32, #tpu.memory_space<vmem>>, vector<4x8x1xf32>,
      %c0_33 = arith.constant 0 : index
      %c0_34 = arith.constant 0 : index
      %c0_35 = arith.constant 0 : index
      %48 = vector.load %arg11[%c0_33, %c0_34, %c0_35] : memref<4x8x1xf32, #tpu.memory_space<vmem>>, vector<4x8x1xf32>
      %49 = tpu.reciprocal %48 {approx = true} : vector<4x8x1xf32> -> vector<4x8x1xf32>
      %c0_36 = arith.constant 0 : index
      %c0_37 = arith.constant 0 : index
      %c0_38 = arith.constant 0 : index
      %50 = vector.load %arg12[%c0_36, %c0_37, %c0_38] : memref<4x8x8xf32, #tpu.memory_space<vmem>>, vector<4x8x8xf32>
      %51 = vector.broadcast %49 : vector<4x8x1xf32> to vector<4x8x8xf32>
      %52 = arith.mulf %50, %51 : vector<4x8x8xf32>
      %53 = arith.truncf %52 : vector<4x8x8xf32> to vector<4x8x8xbf16>
      %c0_39 = arith.constant 0 : index
      %c0_40 = arith.constant 0 : index
      %c0_41 = arith.constant 0 : index
      %54 = vector.load %arg8[%c0_39, %c0_40, %c0_41] : memref<4x8x8xbf16, #tpu.memory_space<vmem>>, vector<4x8x8xbf16>
      tpu.vector_store %arg8[%c0_39, %c0_40, %c0_41], %53 {strides = array<i32>} : memref<4x8x8xbf16, #tpu.memory_space<vmem>>, vector<4x8x8xbf16>,
    } else {
    }
    return
  }
  func.func @transform_0(%arg0: i32, %arg1: i32, %arg2: i32, %arg3: memref<1xi32, #tpu.memory_space<smem>>, %arg4: memref<1xi32, #tpu.memory_space<smem>>) -> (i32, i32, i32) {
    %0 = arith.index_cast %arg2 : i32 to index
    %1 = memref.load %arg3[%0] : memref<1xi32, #tpu.memory_space<smem>>
    %c0_i32 = arith.constant 0 : i32
    %c0_i32_0 = arith.constant 0 : i32
    return %arg0, %1, %c0_i32 : i32, i32, i32
  }
  func.func @transform_1(%arg0: i32, %arg1: i32, %arg2: i32, %arg3: memref<1xi32, #tpu.memory_space<smem>>, %arg4: memref<1xi32, #tpu.memory_space<smem>>) -> (i32, i32, i32) {
    %0 = arith.index_cast %arg2 : i32 to index
    %1 = memref.load %arg4[%0] : memref<1xi32, #tpu.memory_space<smem>>
    %c0_i32 = arith.constant 0 : i32
    %c0_i32_0 = arith.constant 0 : i32
    return %arg0, %1, %c0_i32 : i32, i32, i32
  }
  func.func @transform_2(%arg0: i32, %arg1: i32, %arg2: i32, %arg3: memref<1xi32, #tpu.memory_space<smem>>, %arg4: memref<1xi32, #tpu.memory_space<smem>>) -> (i32, i32, i32) {
    %0 = arith.index_cast %arg2 : i32 to index
    %1 = memref.load %arg4[%0] : memref<1xi32, #tpu.memory_space<smem>>
    %c0_i32 = arith.constant 0 : i32
    %c0_i32_0 = arith.constant 0 : i32
    return %arg0, %1, %c0_i32 : i32, i32, i32
  }
  func.func @transform_3(%arg0: i32, %arg1: i32, %arg2: i32, %arg3: memref<1xi32, #tpu.memory_space<smem>>, %arg4: memref<1xi32, #tpu.memory_space<smem>>) -> (i32, i32, i32) {
    %0 = arith.index_cast %arg2 : i32 to index
    %1 = memref.load %arg3[%0] : memref<1xi32, #tpu.memory_space<smem>>
    %c0_i32 = arith.constant 0 : i32
    %c0_i32_0 = arith.constant 0 : i32
    return %arg0, %1, %c0_i32 : i32, i32, i32
  }
}

</mosaic_0001>

<bundles_post_ra>
// kernel: tpu_custom_call.1
= control target key start
LH: loop header
LB: loop body
LE: loop exit
PB: predicated region body
PF: predicated region fallthrough
CT: control target
= control target key end

     0   :  { %s2992_s0 = inlined_call_operand.<no memory space> [shape: s32[1], index: 0, kind: input, shape index: {}]   ;;  %s2993_s1 = inlined_call_operand.<no memory space> [shape: s32[1], index: 1, kind: input, shape index: {}]   ;;  %s2994_s2 = inlined_call_operand.hbm [shape: bf16[8,8,8], index: 2, kind: input, shape index: {}]   ;;  %s2995_s3 = inlined_call_operand.hbm [shape: bf16[8,8,8], index: 3, kind: input, shape index: {}]   ;;  %s2996_s4 = inlined_call_operand.hbm [shape: bf16[8,8,8], index: 4, kind: input, shape index: {}]   ;;  %s2997_s5 = inlined_call_operand.hbm [shape: bf16[8,8,8], index: 5, kind: output, shape index: {}]  }
   0x1   :  { %3018 = sst [smem:[#allocation29_spill]] %s2994_s2 }
   0x2   :  { %3019 = sst [smem:[#allocation30_spill]] %s2995_s3 }
   0x3   :  { %3020 = sst [smem:[#allocation31_spill]] %s2997_s5 }
   0x4   :  { %10 = sst [smem:[#allocation7]] %s2992_s0 }
   0x5   :  { %11 = sst [smem:[#allocation8]] %s2993_s1 }
   0x6   :  { %12 = vsyncpa [#allocation10], 0 }
   0x7   :  { %14 = vsyncpa [#allocation10 + $0x1], 0 }
   0x8   :  { %15 = vsyncpa [#allocation13], 0 }
   0x9   :  { %17 = vsyncpa [#allocation13 + $0x1], 0 }
   0xa   :  { %18 = vsyncpa [#allocation11], 0 }
   0xb   :  { %20 = vsyncpa [#allocation11 + $0x1], 0  ;;  %s2280_s22 = smov 0   ;;  %s2282_s23 = smov 0  }
   0xc   :  { %s2284_s24 = smov 0   ;;  %s2286_s25 = smov 0  }
   0xd   :  { %s2288_s26 = smov 0   ;;  %s2290_s0 = smov 0  }
   0xe   :  { %s2292_s27 = smov 0   ;;  %s2294_s1 = smov 0  }
   0xf   :  { %s2296_s28 = smov 0   ;;  %s2298_s29 = smov 0  }
  0x10   :  { %s2300_s30 = smov 0   ;;  %s2302_s6 = smov 0  }
  0x11   :  { %s2304_s7 = smov 0   ;;  %s2306_s8 = smov 0  }
  0x12   :  { %s2308_s9 = smov 0  }
  0x13 LB: > { %3021 = sst [smem:[#allocation20_spill]] %s2170_s22  ;;  %s2354_s10 = sadd.s32 4294967295, %s2226_s9   ;;  %s2226_s9 = sphi %s2308_s9, %s26_s9   ;;  %s2222_s8 = sphi %s2306_s8, %s3072_s8   ;;  %s2218_s7 = sphi %s2304_s7, %s3071_s7   ;;  %s2214_s6 = sphi %s2302_s6, %s3081_s6   ;;  %s2210_s30 = sphi %s2300_s30, %s3080_s30   ;;  %s2206_s29 = sphi %s2298_s29, %s3079_s29   ;;  %s2202_s28 = sphi %s2296_s28, %s3078_s28   ;;  %s2198_s1 = sphi %s2294_s1, %s3077_s1   ;;  %s2194_s27 = sphi %s2292_s27, %s3076_s27   ;;  %s2190_s0 = sphi %s2290_s0, %s3075_s0   ;;  %s2186_s26 = sphi %s2288_s26, %s3074_s26   ;;  %s2182_s25 = sphi %s2286_s25, %s3073_s25   ;;  %s2178_s24 = sphi %s2284_s24, %s3069_s24   ;;  %s2174_s23 = sphi %s2282_s23, %s3068_s23   ;;  %s2170_s22 = sphi %s2280_s22, %s3067_s22  }
  0x14   : > { %3022 = sst [smem:[#allocation21_spill]] %s2174_s23  ;;  %s1605_s11 = sadd.s32 4294967294, %s2226_s9  }
  0x15   : > { %3023 = sst [smem:[#allocation22_spill]] %s2178_s24  ;;  %s45_s12 = sadd.s32 1, %s2222_s8 }
  0x16   : > { %3024 = sst [smem:[#allocation23_spill]] %s2218_s7  ;;  %s2358_s13 = sld [smem:[#allocation7]] }
  0x17   : > { %3025 = sst [smem:[#allocation24_spill]] %s2222_s8  ;;  %p47_p0 = scmp.ge.s32.totalorder %s45_s12, 2 }
  0x18   : > { %p3009_p1 = scmp.eq.s32.totalorder %s2226_s9, 0  ;;  %p3006_p2 = scmp.eq.s32.totalorder %s2354_s10, 0 }
  0x19   : > { %s79_s14 = sld [smem:[#allocation8]]  ;;  %s3083_s12 = smov (%p47_p0, %s45_s12), 0 }
  0x1a   : > { %3026 = sst [smem:[#allocation25_spill]] %s3083_s12  ;;  %s86_s15 = sadd.s32 1, %s2202_s28 }
  0x1b   : > { %p93_p3 = scmp.ne.s32.totalorder %s2202_s28, %s2198_s1  ;;  %s51_s16 = ssub.s32 %s2222_s8, %s3083_s12 }
  0x1c   : > { %p99_p4 = scmp.ne.s32.totalorder %s2198_s1, %s2194_s27  ;;  %p2382_p7 = scmp.eq.s32.totalorder %s51_s16, 0 }
  0x1d   : > { %p2372_p5 = por %p93_p3, %p3009_p1  ;;  %s146_s20 = sadd.s32 1, %s2178_s24 }
  0x1e   : > { %p2378_p6 = por %p99_p4, %p3006_p2  ;;  %p156_p8 = scmp.ne.s32.totalorder %s2178_s24, %s2174_s23 }
  0x1f   : > { %s2392_s21 = scalar_select %p2382_p7, %s2178_s24, %s146_s20  }
  0x20   : > { %s3028_s18 = scalar_select %p2378_p6, 1, 0 }
  0x21   : > { %3030 = sst [smem:[#allocation26_spill]] %s2392_s21  ;;  %p157_p9 = scmp.eq.s32.totalorder %s2354_s10, 1 }
  0x22   : > { %s2397_s27 = scalar_select %p2382_p7, %s2202_s28, %s86_s15  }
  0x23   : > { %p162_p10 = scmp.ne.s32.totalorder %s2174_s23, %s2170_s22  ;;  %p163_p11 = scmp.eq.s32.totalorder %s1605_s11, 1 }
  0x24   : > { %3031 = sst [smem:[#allocation27_spill]] %s2397_s27  ;;  %p2403_p13 = por %p157_p9, %p156_p8 }
  0x25   : > { %p3008_p0 = scmp.lt.s32.totalorder %s2226_s9, 2  ;;  %p2408_p3 = por %p163_p11, %p162_p10 }
  0x26   : > { %s3032_s16 = scalar_select %p2403_p13, 1, 0 }
  0x27   : > { %s3034_s12 = scalar_select %p2408_p3, 1, 0 }
  0x28   : > { %3033 = sst [smem:[#allocation28_spill]] %s3032_s16  ;;  %s1609_s20 = sshll.u32 %s2222_s8, 2 }
  0x29   : > { %s206_s15 = sand.u32 1, %s2226_s9   ;;  %s208_s27 = sand.u32 1, %s2202_s28  }
  0x2a   : > { %s1611_s21 = sshll.u32 %s208_s27, 4  ;;  %s2417_s24 = sadd.s32 %s1609_s20, %s79_s14 }
  0x2b   : > { %s3007_s11 = sshll.u32 %s2417_s24, 6  ;;  %s210_s22 = scalar_lea.vmem [#allocation12], %s1611_s21 }
  0x2c   : > { %s219_s5 = sshll.u32 %s210_s22, 4  ;;  %s3035_s3 = sld [smem:[#allocation30_spill]]  ;;  %s2427_s5 = int_to_ptr.vmem [resolvable:$true] %s219_s5 }
  0x2d   : > { %p2433_p4 = pnand %p3008_p0, %p2372_p5  ;;  %s2439_s22 = scalar_lea.sflag [#allocation13], %s206_s15 }
  0x2f   : > { %p1976_p11 = pneg %p2433_p4 }
  0x32   : > { %s2425_s23 = scalar_lea.hbm %s3035_s3, %s3007_s11  ;;  %s1979_s27 = scalar_lea.hbm %s3035_s3, 512 }
  0x33   : > { %s1974_s7 = scalar_lea.hbm %s2425_s23, 256  ;;  %p1980_p5 = scmp.lt.u32.totalorder %s2425_s23, %s3035_s3 }
  0x34   : > { %p1975_p10 = scmp.ne.s32.totalorder %s2425_s23, %s1974_s7  ;;  %p1981_p0 = scmp.lt.u32.totalorder %s1979_s27, %s1974_s7 }
  0x35   : > { %p1983_p8 = scmp.lt.u32.totalorder %s1974_s7, %s2425_s23 }
  0x36   : > { %p1977_p12 = pnand %p1976_p11, %p1975_p10  ;;  %p1982_p1 = por %p1981_p0, %p1980_p5 }
  0x38   : > { %p1978_p2 = pneg %p1977_p12  ;;  %p1984_p9 = por %p1983_p8, %p1982_p1 }
  0x3a   : > { %p1985_p3 = pnand %p1984_p9, %p1978_p2 }
  0x3c   : > { %1988 = shalt.err (!%p1985_p3)
}
  0x3d   : > { %s1989_s15 = scalar_lea.vmem %s2427_s5, 256  ;;  %s2228_s17 = smov [#allocation12]  }
  0x3e   : > { %p1990_p12 = scmp.ne.s32.totalorder %s2427_s5, %s1989_s15  ;;  %s1994_s21 = sshll.u32 %s2228_s17, 4  ;;  %s1995_s21 = int_to_ptr.vmem [resolvable:$false] %s1994_s21 }
  0x3f   : > { %s1996_s11 = scalar_lea.vmem %s1995_s21, 512  ;;  %p1997_p6 = scmp.lt.s32.totalorder %s2427_s5, %s1995_s21 }
  0x40   : > { %p1992_p10 = pnand %p1990_p12, %p1976_p11  ;;  %p1998_p0 = scmp.lt.s32.totalorder %s1996_s11, %s1989_s15 }
  0x42   : > { %p1993_p13 = pneg %p1992_p10  ;;  %p1999_p5 = por %p1998_p0, %p1997_p6 }
  0x44   : > { %p2000_p1 = pnand %p1999_p5, %p1993_p13 }
  0x46   : > { %2003 = shalt.err (!%p2000_p1)
}
  0x47   : > { %s3012_s7 = smov 64   ;;  %s3014_s27 = smov 4  }
  0x48   : > { %1788 = dma.hbm_to_vmem [thread:$0]  (!%p2433_p4), %s2425_s23, 256, %s2427_s5, %s2439_s22, %s3012_s7, %s3012_s7, %s3014_s27  }
  0x49   : > { %p3037_p2 = scmp.lt.s32.totalorder %s2226_s9, 3  ;;  %p3038_p6 = scmp.ge.s32.totalorder %s2226_s9, 1 }
  0x4a   : > { %s56_s15 = sadd.s32 1, %s2214_s6  ;;  %p63_p3 = scmp.ne.s32.totalorder %s2214_s6, %s2210_s30 }
  0x4b   : > { %p2474_p13 = pnand %p3038_p6, %p3037_p2  ;;  %p69_p8 = scmp.ne.s32.totalorder %s2210_s30, %s2206_s29 }
  0x4c   : > { %s2482_s17 = scalar_select %p2382_p7, %s2214_s6, %s56_s15  }
  0x4d   : > { %s3039_s16 = scalar_select %p2474_p13, 1, 0 }
  0x4e   : > { %s183_s21 = sand.u32 1, %s2214_s6   ;;  %s193_s14 = sadd.s32 %s1609_s20, %s2358_s13 }
  0x4f   : > { %p3040_p9 = scmp.eq.s32.totalorder %s2226_s9, 0  ;;  %p3041_p12 = scmp.eq.s32.totalorder %s2354_s10, 0 }
  0x50   : > { %s1608_s23 = sshll.u32 %s183_s21, 4  ;;  %s1610_s11 = sshll.u32 %s193_s14, 6 }
  0x51   : > { %p65_p11 = por %p3040_p9, %p63_p3  ;;  %p2496_p4 = por %p3041_p12, %p69_p8 }
  0x52   : > { %s3043_s2 = sld [smem:[#allocation29_spill]]  ;;  %s187_s29 = scalar_lea.vmem [#allocation9], %s1608_s23 }
  0x53   : > { %s3042_s5 = scalar_select %p2496_p4, 1, 0 }
  0x54   : > { %s196_s13 = sshll.u32 %s187_s29, 4  ;;  %p3044_p10 = scmp.lt.s32.totalorder %s2226_s9, 2  ;;  %s2505_s13 = int_to_ptr.vmem [resolvable:$true] %s196_s13 }
  0x55   : > { %s2513_s15 = scalar_lea.sflag [#allocation10], %s183_s21 }
  0x56   : > { %p2509_p0 = pnand %p3044_p10, %p65_p11 }
  0x58   : > { %s2503_s3 = scalar_lea.hbm %s3043_s2, %s1610_s11  ;;  %p2006_p1 = pneg %p2509_p0 }
  0x59   : > { %s2004_s7 = scalar_lea.hbm %s2503_s3, 256  ;;  %s2009_s23 = scalar_lea.hbm %s3043_s2, 512 }
  0x5a   : > { %p2005_p5 = scmp.ne.s32.totalorder %s2503_s3, %s2004_s7  ;;  %p2010_p3 = scmp.lt.u32.totalorder %s2503_s3, %s3043_s2 }
  0x5b   : > { %p2011_p8 = scmp.lt.u32.totalorder %s2009_s23, %s2004_s7  ;;  %p2013_p11 = scmp.lt.u32.totalorder %s2004_s7, %s2503_s3 }
  0x5c   : > { %p2007_p2 = pnand %p2006_p1, %p2005_p5 }
  0x5d   : > { %p2012_p9 = por %p2011_p8, %p2010_p3 }
  0x5e   : > { %p2008_p6 = pneg %p2007_p2 }
  0x5f   : > { %p2014_p12 = por %p2013_p11, %p2012_p9 }
  0x61   : > { %p2015_p10 = pnand %p2014_p12, %p2008_p6 }
  0x63   : > { %2018 = shalt.err (!%p2015_p10)
}
  0x64   : > { %s2019_s21 = scalar_lea.vmem %s2505_s13, 256  ;;  %s2231_s27 = smov [#allocation9]  }
  0x65   : > { %p2020_p5 = scmp.ne.s32.totalorder %s2505_s13, %s2019_s21  ;;  %s2024_s14 = sshll.u32 %s2231_s27, 4  ;;  %s2025_s14 = int_to_ptr.vmem [resolvable:$false] %s2024_s14 }
  0x66   : > { %s2026_s11 = scalar_lea.vmem %s2025_s14, 512  ;;  %p2027_p13 = scmp.lt.s32.totalorder %s2505_s13, %s2025_s14 }
  0x67   : > { %p2022_p2 = pnand %p2020_p5, %p2006_p1  ;;  %p2028_p3 = scmp.lt.s32.totalorder %s2026_s11, %s2019_s21 }
  0x69   : > { %p2023_p4 = pneg %p2022_p2  ;;  %p2029_p8 = por %p2028_p3, %p2027_p13 }
  0x6b   : > { %p2030_p9 = pnand %p2029_p8, %p2023_p4 }
  0x6d   : > { %2033 = shalt.err (!%p2030_p9)
}
  0x6e   : > { %s3046_s7 = smov 4   ;;  %s3047_s23 = smov 64  }
  0x6f   : > { %1785 = dma.hbm_to_vmem [thread:$0]  (!%p2509_p0), %s2503_s3, 256, %s2505_s13, %s2513_s15, %s3047_s23, %s3047_s23, %s3046_s7  }
  0x70   : > { %s116_s20 = sadd.s32 1, %s2190_s0  ;;  %p123_p13 = scmp.ne.s32.totalorder %s2190_s0, %s2186_s26 }
  0x71   : > { %s2548_s29 = scalar_select %p2382_p7, %s2190_s0, %s116_s20  }
  0x72   : > { %p129_p4 = scmp.ne.s32.totalorder %s2186_s26, %s2182_s25  ;;  %s231_s21 = sand.u32 1, %s2190_s0  }
  0x73   : > { %p3048_p1 = scmp.eq.s32.totalorder %s2226_s9, 0  ;;  %p3049_p11 = scmp.eq.s32.totalorder %s2354_s10, 0 }
  0x74   : > { %s1614_s14 = sshll.u32 %s231_s21, 4  ;;  %s3051_s11 = sshll.u32 %s2417_s24, 6 }
  0x75   : > { %p125_p6 = por %p123_p13, %p3048_p1  ;;  %p2559_p12 = por %p129_p4, %p3049_p11 }
  0x76   : > { %s2568_s3 = scalar_lea.hbm %s2996_s4, %s3051_s11  ;;  %p3052_p0 = scmp.lt.s32.totalorder %s2226_s9, 2 }
  0x77   : > { %s233_s19 = scalar_lea.vmem [#allocation14], %s1614_s14  ;;  %s2034_s24 = scalar_lea.hbm %s2568_s3, 256 }
  0x78   : > { %p2572_p7 = pnand %p3052_p0, %p125_p6  ;;  %s242_s13 = sshll.u32 %s233_s19, 4  ;;  %s2576_s13 = int_to_ptr.vmem [resolvable:$true] %s242_s13 }
  0x79   : > { %p2035_p10 = scmp.ne.s32.totalorder %s2568_s3, %s2034_s24  ;;  %s2039_s15 = scalar_lea.hbm %s2996_s4, 512 }
  0x7a   : > { %p2036_p5 = pneg %p2572_p7  ;;  %p2040_p8 = scmp.lt.u32.totalorder %s2568_s3, %s2996_s4 }
  0x7b   : > { %p2041_p9 = scmp.lt.u32.totalorder %s2039_s15, %s2034_s24  ;;  %p2043_p4 = scmp.lt.u32.totalorder %s2034_s24, %s2568_s3 }
  0x7c   : > { %p2037_p2 = pnand %p2036_p5, %p2035_p10 }
  0x7d   : > { %p2042_p13 = por %p2041_p9, %p2040_p8 }
  0x7e   : > { %p2038_p3 = pneg %p2037_p2 }
  0x7f   : > { %p2044_p1 = por %p2043_p4, %p2042_p13 }
  0x81   : > { %p2045_p6 = pnand %p2044_p1, %p2038_p3 }
  0x83   : > { %2048 = shalt.err (!%p2045_p6)
}
  0x84   : > { %s2049_s14 = scalar_lea.vmem %s2576_s13, 256  ;;  %s2232_s11 = smov [#allocation14]  }
  0x85   : > { %p2050_p11 = scmp.ne.s32.totalorder %s2576_s13, %s2049_s14  ;;  %s2054_s19 = sshll.u32 %s2232_s11, 4  ;;  %s2055_s19 = int_to_ptr.vmem [resolvable:$false] %s2054_s19 }
  0x86   : > { %s2056_s2 = scalar_lea.vmem %s2055_s19, 512  ;;  %p2057_p2 = scmp.lt.s32.totalorder %s2576_s13, %s2055_s19 }
  0x87   : > { %p2052_p0 = pnand %p2050_p11, %p2036_p5  ;;  %p2058_p8 = scmp.lt.s32.totalorder %s2056_s2, %s2049_s14 }
  0x89   : > { %p2053_p10 = pneg %p2052_p0  ;;  %p2059_p9 = por %p2058_p8, %p2057_p2 }
  0x8b   : > { %p2060_p13 = pnand %p2059_p9, %p2053_p10 }
  0x8d   : > { %2063 = shalt.err (!%p2060_p13)
}
  0x8e   : > { %1791 = dma.hbm_to_vmem [thread:$0]  (!%p2572_p7), %s2568_s3, 256, %s2576_s13, %s2439_s22, %s3047_s23, %s3047_s23, %s3046_s7  }
  0x8f   : > { %p3054_p5 = scmp.ne.s32.totalorder %s3039_s16, 0 }
  0x90   : > { %s256_s24 = sand.u32 (!%p3054_p5), 1, %s2210_s30   ;;  %p3055_p3 = scmp.ne.s32.totalorder (!%p3054_p5), %s3042_s5, 0 }
  0x91   : > { %254 = sbr.rel (%p3054_p5) target bundleno = 1769 (0x6e9), region = 32  ;;  %s1618_s8 = sshll.u32 (!%p3054_p5), %s256_s24, 4 }
  0x92   : > { %s257_s15 = scalar_lea.sflag (!%p3054_p5), [#allocation10], %s256_s24  ;;  %s260_s20 = scalar_lea.vmem (!%p3054_p5), [#allocation9], %s1618_s8 }
  0x98   : > { %2153 = dma.done.wait (%p3055_p3), %s257_s15, 256  }
  0x99   : > { %2155 = vsyncadd (%p3055_p3), %s257_s15, 4294967040  ;;  %s265_s25 = sand.u32 1, %s2354_s10   ;;  %s267_s21 = sand.u32 1, %s2198_s1  }
  0x9a   : > { %s1619_s22 = sshll.u32 %s267_s21, 4  ;;  %s266_s7 = scalar_lea.sflag [#allocation13], %s265_s25 }
  0x9b   : > { %s2616_s16 = scalar_lea.vmem [#allocation12], %s1619_s22  ;;  %p3056_p7 = scmp.ne.s32.totalorder %s3028_s18, 0 }
  0x9d   : > { %2157 = dma.done.wait (%p3056_p7), %s266_s7, 256  }
  0x9e   : > { %2159 = vsyncadd (%p3056_p7), %s266_s7, 4294967040  ;;  %s276_s23 = sand.u32 1, %s2186_s26  }
  0x9f   : > { %s1620_s3 = sshll.u32 %s276_s23, 4 }
  0xa0   : > { %s2623_s5 = scalar_lea.vmem [#allocation14], %s1620_s3 }
  0xa1   : > { %2161 = dma.done.wait (%p2559_p12), %s266_s7, 256  }
  0xa2   : > { %2163 = vsyncadd (%p2559_p12), %s266_s7, 4294967040  ;;  %s3057_s10 = sld [smem:[#allocation21_spill]]  ;;  %s2630_s14 = sld [smem:[#allocation7]] }
  0xa3   : > { %s2632_s11 = sld [smem:[#allocation8]] }
  0xa8   : > { %s308_s13 = sand.u32 1, %s3057_s10  }
  0xa9   : > { %s1621_s18 = sshll.u32 %s308_s13, 4  ;;  %p1622_p4 = scmp.ne.s32.totalorder %s2632_s11, 0 }
  0xaa   : > { %s2636_s19 = scalar_lea.vmem [#allocation15], %s1621_s18  ;;  %v327_v0 = vld [vmem:[%s260_s20] sm:$0xf] (!%p1622_p4)  ;;  %vm335_vm0 = vcmask (!%p1622_p4), 60416   ;;  %v328_v1 = vld [vmem:[%s260_s20 + $0x4] sm:$0xf] (!%p1622_p4) }
  0xab   : > { %326 = sbr.rel (%p1622_p4) target bundleno = 181 (0xb5), region = 48  ;;  %vm340_vm1 = vcmask (!%p1622_p4), 7168   ;;  %v331_v2 = vmul.bf16 (!%p1622_p4), 1052065461, %v327_v0  ;;  %v332_v3 = vmul.bf16 (!%p1622_p4), 1052065461, %v328_v1 }
  0xac   : > { %v329_v4 = vld [vmem:[%s260_s20 + $0x8] sm:$0xf] (!%p1622_p4)  ;;  %v330_v6 = vld [vmem:[%s260_s20 + $0xc] sm:$0xf] (!%p1622_p4)  ;;  %v2233_v8 = vmov (!%p1622_p4), -1e+30  }
  0xad   : > { %v333_v5 = vmul.bf16 (!%p1622_p4), 1052065461, %v329_v4  ;;  %336 = vst.msk [vmem:[#allocation2] sm:$0xf] (!%p1622_p4), %vm335_vm0, %v331_v2  ;;  %337 = vst.msk [vmem:[#allocation2 + $0x4] sm:$0xf] (!%p1622_p4), %vm335_vm0, %v332_v3 }
  0xae   : > { %v334_v7 = vmul.bf16 (!%p1622_p4), 1052065461, %v330_v6  ;;  %341 = vst.msk [vmem:[#allocation3] sm:$0xff] (!%p1622_p4), %vm340_vm1, %v2233_v8  ;;  %342 = vst.msk [vmem:[#allocation3 + $0x8] sm:$0xff] (!%p1622_p4), %vm340_vm1, %v2233_v8  ;;  %vm349_vm2 = vcmask (!%p1622_p4), 64512   ;;  %v2234_v9 = vmov (!%p1622_p4), 0.0  }
  0xaf   : > { %343 = vst.msk [vmem:[#allocation3 + $0x10] sm:$0xff] (!%p1622_p4), %vm340_vm1, %v2233_v8  ;;  %344 = vst.msk [vmem:[#allocation3 + $0x18] sm:$0xff] (!%p1622_p4), %vm340_vm1, %v2233_v8 }
  0xb0   : > { %338 = vst.msk [vmem:[#allocation2 + $0x8] sm:$0xf] (!%p1622_p4), %vm335_vm0, %v333_v5  ;;  %339 = vst.msk [vmem:[#allocation2 + $0xc] sm:$0xf] (!%p1622_p4), %vm335_vm0, %v334_v7 }
  0xb1   : > { %345 = vst.msk [vmem:[#allocation4] sm:$0xff] (!%p1622_p4), %vm340_vm1, %v2234_v9  ;;  %346 = vst.msk [vmem:[#allocation4 + $0x8] sm:$0xff] (!%p1622_p4), %vm340_vm1, %v2234_v9 }
  0xb2   : > { %347 = vst.msk [vmem:[#allocation4 + $0x10] sm:$0xff] %vm340_vm1, %v2234_v9  ;;  %348 = vst.msk [vmem:[#allocation4 + $0x18] sm:$0xff] %vm340_vm1, %v2234_v9 }
  0xb3   : > { %350 = vst.msk [vmem:[#allocation5] sm:$0xff] %vm349_vm2, %v2234_v9  ;;  %351 = vst.msk [vmem:[#allocation5 + $0x8] sm:$0xff] %vm349_vm2, %v2234_v9 }
  0xb4   : > { %352 = vst.msk [vmem:[#allocation5 + $0x10] sm:$0xff] %vm349_vm2, %v2234_v9  ;;  %353 = vst.msk [vmem:[#allocation5 + $0x18] sm:$0xff] %vm349_vm2, %v2234_v9 }
  0xb5 PF: > { %p1623_p12 = scmp.ge.s32.totalorder %s2632_s11, %s2630_s14 }
  0xb6   : > { %v362_v10 = vld [vmem:[%s2616_s16] sm:$0xf] (!%p1623_p12)  ;;  %vm370_vm3 = vcmask (!%p1623_p12), 64512   ;;  %v363_v11 = vld [vmem:[%s2616_s16 + $0x4] sm:$0xf] (!%p1623_p12)  ;;  %v2235_v12 = vmov (!%p1623_p12), 0.0  }
  0xb7   : > { %357 = sbr.rel (%p1623_p12) target bundleno = 920 (0x398), region = 52  ;;  %1678 = vmatprep.subr.bf16.mxu0 (!%p1623_p12), %v2235_v12  ;;  %v375_v13 = vsel (!%p1623_p12), %vm370_vm3, %v362_v10, 0  ;;  %1684 = vmatprep.subr.bf16.mxu1 (!%p1623_p12), %v2235_v12  ;;  %v421_v14 = vsel (!%p1623_p12), %vm370_vm3, %v363_v11, 0  ;;  %vm2236_vm4 = vmmov (!%p1623_p12), 0   ;;  %v364_v15 = vld [vmem:[%s2616_s16 + $0x8] sm:$0xf] (!%p1623_p12) }
  0xb8   : > { %1679 = vmatpush3.bf16.xpose.msra.mxu0 (!%p1623_p12), %v375_v13  ;;  %1685 = vmatpush3.bf16.xpose.msra.mxu1 (!%p1623_p12), %v421_v14  ;;  %v365_v16 = vld [vmem:[%s2616_s16 + $0xc] sm:$0xf] (!%p1623_p12)  ;;  %v358_v17 = vld [vmem:[#allocation2] sm:$0xf] (!%p1623_p12)  ;;  %v359_v18 = vld [vmem:[#allocation2 + $0x4] sm:$0xf] (!%p1623_p12) }
  0xb9   : > { %1680 = vmatprep.mubr.msk.bf16.mxu0 (!%p1623_p12), %vm2236_vm4, %v2235_v12  ;;  %1690 = vmatprep.subr.bf16.mxu0 (!%p1623_p12), %v2235_v12  ;;  %v467_v19 = vsel (!%p1623_p12), %vm370_vm3, %v364_v15, 0  ;;  %v513_v20 = vsel (!%p1623_p12), %vm370_vm3, %v365_v16, 0  ;;  %v2237_v43 = vmov (!%p1623_p12), 0   ;;  %v555_v44 = vld [vmem:[#allocation3] sm:$0xff] (!%p1623_p12)  ;;  %vm643_vm5 = vcmask (!%p1623_p12), 7168   ;;  %v2699_v47 = vld [vmem:[#allocation3 + $0x8] sm:$0xff] (!%p1623_p12) }
  0xba   : > { %1686 = vmatprep.mubr.msk.bf16.mxu1 (!%p1623_p12), %vm2236_vm4, %v2235_v12  ;;  %1696 = vmatprep.subr.bf16.mxu1 (!%p1623_p12), %v2235_v12  ;;  %v360_v21 = vld [vmem:[#allocation2 + $0x8] sm:$0xf] (!%p1623_p12)  ;;  %v361_v22 = vld [vmem:[#allocation2 + $0xc] sm:$0xf] (!%p1623_p12)  ;;  %v557_v52 = vld [vmem:[#allocation3 + $0x10] sm:$0xff] (!%p1623_p12)  ;;  %vm683_vm6 = vcmask (!%p1623_p12), 1043456  }
  0xbb   : > { %1930 = vset.pattern.permute.xlu0 (!%p1623_p12), %v2237_v43  ;;  %1931 = vset.pattern.permute.xlu1 (!%p1623_p12), %v2237_v43  ;;  %v2710_v56 = vld [vmem:[#allocation3 + $0x18] sm:$0xff] (!%p1623_p12)  ;;  %v366_v61 = vld [vmem:[%s2623_s5] sm:$0xf] (!%p1623_p12)  ;;  %v367_v0 = vld [vmem:[%s2623_s5 + $0x4] sm:$0xf] (!%p1623_p12) }
  0xbc   : > { %v685_v62 = vsel (!%p1623_p12), %vm683_vm6, %v366_v61, 0  ;;  %v731_v1 = vsel (!%p1623_p12), %vm683_vm6, %v367_v0, 0  ;;  %v368_v14 = vld [vmem:[%s2623_s5 + $0x8] sm:$0xf] (!%p1623_p12)  ;;  %v650_v0 = vld [vmem:[#allocation5 + $0x10] sm:$0xff] (!%p1623_p12) }
  0xbf   : > { %1681 = vmatmul.mubr.msk.bf16.vlgmr.msra.gmra.mrb[0].mxu0 %vm370_vm3, %v358_v17  ;;  %1687 = vmatmul.mubr.msk.bf16.vlgmr.msra.gmra.mrb[0].mxu1 %vm370_vm3, %v359_v18 }
  0xc0   : > { %1691 = vmatpush3.bf16.xpose.msra.mxu0 %v467_v19  ;;  %1697 = vmatpush3.bf16.xpose.msra.mxu1 %v513_v20  ;;  %v777_v19 = vsel %vm683_vm6, %v368_v14, 0  ;;  %v369_v20 = vld [vmem:[%s2623_s5 + $0xc] sm:$0xf] }
  0xc1   : > { %1692 = vmatprep.mubr.msk.bf16.mxu0 %vm2236_vm4, %v2235_v12  ;;  %1698 = vmatprep.mubr.msk.bf16.mxu1 %vm2236_vm4, %v2235_v12 }
  0xc2   : > { %1702 = vmatprep.subr.bf16.mxu0 %v2235_v12  ;;  %1708 = vmatprep.subr.bf16.mxu1 %v2235_v12 }
  0xc7   : > { %1693 = vmatmul.mubr.msk.bf16.vlgmr.msra.gmra.mrb[4].mxu0 %vm370_vm3, %v360_v21  ;;  %1699 = vmatmul.mubr.msk.bf16.vlgmr.msra.gmra.mrb[4].mxu1 %vm370_vm3, %v361_v22 }
  0xc8   : > { %1704 = vmatprep.mubr.msk.bf16.mxu0 %vm2236_vm4, %v2235_v12  ;;  %1710 = vmatprep.mubr.msk.bf16.mxu1 %vm2236_vm4, %v2235_v12 }
  0xc9   : > { %1703 = vmatpush3.bf16.msra.mxu0 %v685_v62  ;;  %1709 = vmatpush3.bf16.msra.mxu1 %v731_v1 }
  0xca   : > { %1714 = vmatprep.subr.bf16.mxu0 %v2235_v12  ;;  %1720 = vmatprep.subr.bf16.mxu1 %v2235_v12 }
 0x192   : > { %v2683_v23 = vpop.f32.mrb[0].mxu0  ;;  %v2685_v24 = vpop.f32.mrb[0].mxu1 }
 0x193   : > { %v1682_v25 = vpop.f32.mrb[1].mxu0  ;;  %v559_v26 = vsel %vm370_vm3, %v2683_v23, -inf  ;;  %v1688_v27 = vpop.f32.mrb[1].mxu1  ;;  %v562_v32 = vsel %vm370_vm3, %v2685_v24, -inf }
 0x194   : > { %560 = vmax.xlane.f32.xlu0 %v559_v26  ;;  %v414_v28 = vpop.f32.mrb[2].mxu0  ;;  %v460_v29 = vpop.f32.mrb[2].mxu1  ;;  %v823_v25 = vsel %vm683_vm6, %v369_v20, 0 }
 0x195   : > { %v1683_v30 = vpop.f32.mrb[3].mxu0  ;;  %v1689_v31 = vpop.f32.mrb[3].mxu1 }
 0x198   : > { %563 = vmax.xlane.f32.xlu0 %v562_v32 }
 0x19a   : > { %v2691_v33 = vpop.f32.mrb[4].mxu0  ;;  %v2693_v34 = vpop.f32.mrb[4].mxu1 }
 0x19b   : > { %v1694_v35 = vpop.f32.mrb[5].mxu0  ;;  %v565_v36 = vsel %vm370_vm3, %v2691_v33, -inf  ;;  %v1700_v37 = vpop.f32.mrb[5].mxu1  ;;  %v568_v42 = vsel %vm370_vm3, %v2693_v34, -inf }
 0x19c   : > { %566 = vmax.xlane.f32.xlu1 %v565_v36  ;;  %v506_v38 = vpop.f32.mrb[6].mxu0  ;;  %v552_v39 = vpop.f32.mrb[6].mxu1  ;;  %v619_v37 = vld [vmem:[#allocation4] sm:$0xff] }
 0x19d   : > { %v1695_v40 = vpop.f32.mrb[7].mxu0  ;;  %v1701_v41 = vpop.f32.mrb[7].mxu1 }
 0x19e   : > { %v620_v40 = vld [vmem:[#allocation4 + $0x8] sm:$0xff] }
 0x1a0   : > { %569 = vmax.xlane.f32.xlu1 %v568_v42 }
 0x221   : > { %v561_v45 = vpop.xlane.xlu0 %560 }
 0x222   : > { %v571_v46 = vmax.f32 %v555_v44, %v561_v45 }
 0x224   : > { %v575_v48 = vsub.f32 %v555_v44, %v571_v46  ;;  %873 = vst.msk [vmem:[#allocation3] sm:$0xff] %vm643_vm5, %v571_v46  ;;  %589 = vperm.xlu0 %1930, %v571_v46   ;;  %v621_v46 = vld [vmem:[#allocation4 + $0x10] sm:$0xff] }
 0x225   : > { %v564_v49 = vpop.xlane.xlu0 %563 }
 0x226   : > { %v579_v50 = vmul.f32 1.442695, %v575_v48  ;;  %v2703_v51 = vmax.f32 %v2699_v47, %v564_v49  ;;  %v622_v49 = vld [vmem:[#allocation4 + $0x18] sm:$0xff] }
 0x228   : > { %1932 = vpow2.f32 %v579_v50  ;;  %v576_v53 = vsub.f32 %v2699_v47, %v2703_v51  ;;  %874 = vst.msk [vmem:[#allocation3 + $0x8] sm:$0xff] %vm643_vm5, %v2703_v51  ;;  %594 = vperm.xlu1 %1931, %v2703_v51  }
 0x229   : > { %v567_v54 = vpop.xlane.xlu1 %566 }
 0x22a   : > { %v573_v55 = vmax.f32 %v557_v52, %v567_v54  ;;  %v581_v29 = vmul.f32 1.442695, %v576_v53  ;;  %v648_v54 = vld [vmem:[#allocation5] sm:$0xff] }
 0x22c   : > { %v577_v57 = vsub.f32 %v557_v52, %v573_v55  ;;  %875 = vst.msk [vmem:[#allocation3 + $0x10] sm:$0xff] %vm643_vm5, %v573_v55  ;;  %599 = vperm.xlu1 %1931, %v573_v55  }
 0x22d   : > { %v570_v58 = vpop.xlane.xlu1 %569 }
 0x22e   : > { %v2714_v59 = vmax.f32 %v2710_v56, %v570_v58  ;;  %v583_v22 = vmul.f32 1.442695, %v577_v57 }
 0x230   : > { %v578_v60 = vsub.f32 %v2710_v56, %v2714_v59  ;;  %876 = vst.msk [vmem:[#allocation3 + $0x18] sm:$0xff] %vm643_vm5, %v2714_v59  ;;  %604 = vperm.xlu1 %1931, %v2714_v59   ;;  %v649_v56 = vld [vmem:[#allocation5 + $0x8] sm:$0xff] }
 0x232   : > { %v2723_v63 = vpop.eup %1932 }
 0x233   : > { %v623_v38 = vmul.f32 %v2723_v63, %v619_v37 }
 0x234   : > { %654 = vperm.xlu1 %1931, %v2723_v63  }
 0x2a3   : > { %v590_v2 = vpop.permute.xlu0 %589 }
 0x2a4   : > { %v607_v3 = vsub.f32 %v2683_v23, %v590_v2 }
 0x2a6   : > { %v611_v4 = vmul.f32 1.442695, %v607_v3 }
 0x2a7   : > { %v595_v5 = vpop.permute.xlu1 %594 }
 0x2a8   : > { %1934 = vpow2.f32 %v611_v4  ;;  %v608_v6 = vsub.f32 %v2685_v24, %v595_v5 }
 0x2aa   : > { %v613_v7 = vmul.f32 1.442695, %v608_v6 }
 0x2ab   : > { %v600_v8 = vpop.permute.xlu1 %599 }
 0x2ac   : > { %1936 = vpow2.f32 %v613_v7  ;;  %v609_v9 = vsub.f32 %v2691_v33, %v600_v8  ;;  %v651_v7 = vld [vmem:[#allocation5 + $0x18] sm:$0xff] }
 0x2ae   : > { %v615_v10 = vmul.f32 1.442695, %v609_v9 }
 0x2af   : > { %v605_v11 = vpop.permute.xlu1 %604 }
 0x2b0   : > { %1938 = vpow2.f32 %v615_v10  ;;  %v610_v13 = vsub.f32 %v2693_v34, %v605_v11  ;;  %v585_v34 = vmul.f32 1.442695, %v578_v60 }
 0x2b2   : > { %v1935_v15 = vpop.eup %1934  ;;  %v617_v16 = vmul.f32 1.442695, %v610_v13 }
 0x2b3   : > { %v627_v17 = vsel %vm370_vm3, %v1935_v15, 0.0  ;;  %v676_v18 = vpack.c.bf16 %v1935_v15, %v1935_v15  ;;  %v655_v36 = vpop.permute.xlu1 %654 }
 0x2b4   : > { %1940 = vpow2.f32 %v617_v16  ;;  %628 = vadd.xlane.f32.xlu1 %v627_v17  ;;  %v672_v55 = vmul.f32 %v655_v36, %v648_v54 }
 0x2b5   : > { %1705 = vmatmul.mubr.msk.bf16.vlgmr.msra.gmra.mrb[8].mxu0 %vm370_vm3, %v676_v18  ;;  %1942 = vpow2.f32 %v583_v22 }
 0x2b6   : > { %v1937_v21 = vpop.eup %1936  ;;  %1715 = vmatpush3.bf16.msra.mxu0 %v777_v19  ;;  %1716 = vmatprep.mubr.msk.bf16.mxu0 %vm2236_vm4, %v2235_v12  ;;  %1944 = vpow2.f32 %v581_v29 }
 0x2b7   : > { %v630_v23 = vsel %vm370_vm3, %v1937_v21, 0.0  ;;  %v677_v24 = vpack.c.bf16 %v1937_v21, %v1937_v21  ;;  %1946 = vpow2.f32 %v585_v34 }
 0x2b8   : > { %631 = vadd.xlane.f32.xlu0 %v630_v23 }
 0x2b9   : > { %1711 = vmatmul.mubr.msk.bf16.vlgmr.msra.gmra.mrb[8].mxu1 %vm370_vm3, %v677_v24 }
 0x2ba   : > { %v1939_v26 = vpop.eup %1938  ;;  %1721 = vmatpush3.bf16.msra.mxu1 %v823_v25  ;;  %1722 = vmatprep.mubr.msk.bf16.mxu1 %vm2236_vm4, %v2235_v12 }
 0x2bb   : > { %v678_v27 = vpack.c.bf16 %v1939_v26, %v1939_v26  ;;  %v633_v33 = vsel %vm370_vm3, %v1939_v26, 0.0 }
 0x2bd   : > { %1717 = vmatmul.mubr.msk.bf16.vlgmr.msra.gmra.mrb[12].mxu0 %vm370_vm3, %v678_v27 }
 0x2be   : > { %v1941_v28 = vpop.eup %1940 }
 0x2bf   : > { %v679_v30 = vpack.c.bf16 %v1941_v28, %v1941_v28  ;;  %v1943_v31 = vpop.eup %1942  ;;  %v636_v12 = vsel %vm370_vm3, %v1941_v28, 0.0 }
 0x2c0   : > { %v1945_v32 = vpop.eup %1944  ;;  %v625_v47 = vmul.f32 %v1943_v31, %v621_v46 }
 0x2c1   : > { %1723 = vmatmul.mubr.msk.bf16.vlgmr.msra.gmra.mrb[12].mxu1 %vm370_vm3, %v679_v30  ;;  %v1947_v35 = vpop.eup %1946  ;;  %v624_v42 = vmul.f32 %v1945_v32, %v620_v40 }
 0x2c2   : > { %v626_v51 = vmul.f32 %v1947_v35, %v622_v49 }
 0x2c5   : > { %664 = vperm.xlu1 %1931, %v1943_v31  }
 0x2ce   : > { %659 = vperm.xlu0 %1930, %v1945_v32  }
 0x2e9   : > { %634 = vadd.xlane.f32.xlu1 %v633_v33 }
 0x2ed   : > { %637 = vadd.xlane.f32.xlu1 %v636_v12 }
 0x2fe   : > { %669 = vperm.xlu1 %1931, %v1947_v35  }
 0x341   : > { %v629_v39 = vpop.xlane.xlu1 %628 }
 0x342   : > { %v639_v41 = vadd.f32 %v629_v39, %v623_v38 }
 0x344   : > { %644 = vst.msk [vmem:[#allocation4] sm:$0xff] %vm643_vm5, %v639_v41 }
 0x345   : > { %v632_v43 = vpop.xlane.xlu0 %631  ;;  %v665_v45 = vpop.permute.xlu1 %664 }
 0x346   : > { %v640_v44 = vadd.f32 %v632_v43, %v624_v42  ;;  %v674_v5 = vmul.f32 %v665_v45, %v650_v0 }
 0x348   : > { %645 = vst.msk [vmem:[#allocation4 + $0x8] sm:$0xff] %vm643_vm5, %v640_v44 }
 0x34d   : > { %v660_v57 = vpop.permute.xlu0 %659 }
 0x34e   : > { %v673_v62 = vmul.f32 %v660_v57, %v649_v56 }
 0x376   : > { %v635_v48 = vpop.xlane.xlu1 %634 }
 0x377   : > { %v641_v50 = vadd.f32 %v635_v48, %v625_v47 }
 0x379   : > { %646 = vst.msk [vmem:[#allocation4 + $0x10] sm:$0xff] %vm643_vm5, %v641_v50 }
 0x37a   : > { %v638_v52 = vpop.xlane.xlu1 %637 }
 0x37b   : > { %v642_v53 = vadd.f32 %v638_v52, %v626_v51 }
 0x37d   : > { %647 = vst.msk [vmem:[#allocation4 + $0x18] sm:$0xff] %vm643_vm5, %v642_v53 }
 0x37e   : > { %v670_v8 = vpop.permute.xlu1 %669 }
 0x37f   : > { %v675_v14 = vmul.f32 %v670_v8, %v651_v7 }
 0x388   : > { %v721_v58 = vpop.f32.mrb[8].mxu0 }
 0x389   : > { %v865_v59 = vadd.f32 %v721_v58, %v672_v55  ;;  %v1706_v60 = vpop.f32.mrb[9].mxu0 }
 0x38a   : > { %v724_v61 = vpop.f32.mrb[10].mxu0 }
 0x38b   : > { %869 = vst.msk [vmem:[#allocation5] sm:$0xff] %vm370_vm3, %v865_v59  ;;  %v1707_v63 = vpop.f32.mrb[11].mxu0 }
 0x38c   : > { %v767_v1 = vpop.f32.mrb[8].mxu1 }
 0x38d   : > { %v866_v2 = vadd.f32 %v767_v1, %v673_v62  ;;  %v1712_v3 = vpop.f32.mrb[9].mxu1 }
 0x38e   : > { %v770_v4 = vpop.f32.mrb[10].mxu1 }
 0x38f   : > { %870 = vst.msk [vmem:[#allocation5 + $0x8] sm:$0xff] %vm370_vm3, %v866_v2  ;;  %v1713_v6 = vpop.f32.mrb[11].mxu1 }
 0x390   : > { %v813_v9 = vpop.f32.mrb[12].mxu0 }
 0x391   : > { %v867_v10 = vadd.f32 %v813_v9, %v674_v5  ;;  %v1718_v11 = vpop.f32.mrb[13].mxu0 }
 0x392   : > { %v816_v13 = vpop.f32.mrb[14].mxu0 }
 0x393   : > { %871 = vst.msk [vmem:[#allocation5 + $0x10] sm:$0xff] %vm370_vm3, %v867_v10  ;;  %v1719_v15 = vpop.f32.mrb[15].mxu0 }
 0x394   : > { %v859_v16 = vpop.f32.mrb[12].mxu1 }
 0x395   : > { %v868_v17 = vadd.f32 %v859_v16, %v675_v14  ;;  %v1724_v18 = vpop.f32.mrb[13].mxu1 }
 0x396   : > { %v862_v19 = vpop.f32.mrb[14].mxu1 }
 0x397   : > { %872 = vst.msk [vmem:[#allocation5 + $0x18] sm:$0xff] %vm370_vm3, %v868_v17  ;;  %v1725_v20 = vpop.f32.mrb[15].mxu1 }
 0x398 PF: > { %p1632_p1 = scmp.ne.s32.totalorder %s2632_s11, %s2630_s14 }
 0x399   : > { %v885_v21 = vld [vmem:[%s2616_s16] sm:$0xf] (!%p1632_p1)  ;;  %vm893_vm7 = vcmask (!%p1632_p1), 64512   ;;  %v886_v22 = vld [vmem:[%s2616_s16 + $0x4] sm:$0xf] (!%p1632_p1)  ;;  %v2238_v23 = vmov (!%p1632_p1), 0.0   ;;  %v1078_v12 = vlaneseq (!%p1632_p1) }
 0x39a   : > { %880 = sbr.rel (%p1632_p1) target bundleno = 1740 (0x6cc), region = 56  ;;  %1726 = vmatprep.subr.bf16.mxu0 (!%p1632_p1), %v2238_v23  ;;  %v898_v24 = vsel (!%p1632_p1), %vm893_vm7, %v885_v21, 0  ;;  %1732 = vmatprep.subr.bf16.mxu1 (!%p1632_p1), %v2238_v23  ;;  %v944_v25 = vsel (!%p1632_p1), %vm893_vm7, %v886_v22, 0  ;;  %vm2239_vm8 = vmmov (!%p1632_p1), 0   ;;  %v887_v26 = vld [vmem:[%s2616_s16 + $0x8] sm:$0xf] (!%p1632_p1) }
 0x39b   : > { %1727 = vmatpush3.bf16.xpose.msra.mxu0 (!%p1632_p1), %v898_v24  ;;  %1733 = vmatpush3.bf16.xpose.msra.mxu1 (!%p1632_p1), %v944_v25  ;;  %v888_v27 = vld [vmem:[%s2616_s16 + $0xc] sm:$0xf] (!%p1632_p1)  ;;  %v881_v28 = vld [vmem:[#allocation2] sm:$0xf] (!%p1632_p1)  ;;  %v882_v29 = vld [vmem:[#allocation2 + $0x4] sm:$0xf] (!%p1632_p1) }
 0x39c   : > { %1728 = vmatprep.mubr.msk.bf16.mxu0 (!%p1632_p1), %vm2239_vm8, %v2238_v23  ;;  %1738 = vmatprep.subr.bf16.mxu0 (!%p1632_p1), %v2238_v23  ;;  %v990_v30 = vsel (!%p1632_p1), %vm893_vm7, %v887_v26, 0  ;;  %v1036_v31 = vsel (!%p1632_p1), %vm893_vm7, %v888_v27, 0  ;;  %v883_v32 = vld [vmem:[#allocation2 + $0x8] sm:$0xf] (!%p1632_p1)  ;;  %v884_v33 = vld [vmem:[#allocation2 + $0xc] sm:$0xf] (!%p1632_p1) }
 0x39d   : > { %1734 = vmatprep.mubr.msk.bf16.mxu1 (!%p1632_p1), %vm2239_vm8, %v2238_v23  ;;  %1744 = vmatprep.subr.bf16.mxu1 (!%p1632_p1), %v2238_v23  ;;  %v1079_v34 = vshrl.u32 (!%p1632_p1), %v1078_v12, 7  ;;  %v1081_v35 = vand.u32 (!%p1632_p1), 127, %v1078_v12  ;;  %v2240_v60 = vmov (!%p1632_p1), 0   ;;  %v2814_v61 = vld [vmem:[#allocation3] sm:$0xff] (!%p1632_p1)  ;;  %vm1177_vm10 = vcmask (!%p1632_p1), 7168   ;;  %v2819_v0 = vld [vmem:[#allocation3 + $0x8] sm:$0xff] (!%p1632_p1) }
 0x39e   : > { %1948 = vset.pattern.permute.xlu0 (!%p1632_p1), %v2240_v60  ;;  %1949 = vset.pattern.permute.xlu1 (!%p1632_p1), %v2240_v60  ;;  %v2829_v4 = vld [vmem:[#allocation3 + $0x10] sm:$0xff] (!%p1632_p1)  ;;  %v2839_v8 = vld [vmem:[#allocation3 + $0x18] sm:$0xff] (!%p1632_p1)  ;;  %vm1217_vm11 = vcmask (!%p1632_p1), 1043456   ;;  %vm1451_vm12 = vcmask (!%p1632_p1), 60416  }
 0x39f   : > { %vm1082_vm9 = vcmp.le.s32.totalorder (!%p1632_p1), %v1081_v35, %v1079_v34  ;;  %v889_v14 = vld [vmem:[%s2623_s5] sm:$0xf] (!%p1632_p1)  ;;  %v890_v16 = vld [vmem:[%s2623_s5 + $0x4] sm:$0xf] (!%p1632_p1)  ;;  %v892_v35 = vld [vmem:[%s2623_s5 + $0xc] sm:$0xf] (!%p1632_p1) }
 0x3a0   : > { %v1219_v15 = vsel (!%p1632_p1), %vm1217_vm11, %v889_v14, 0  ;;  %v1265_v17 = vsel (!%p1632_p1), %vm1217_vm11, %v890_v16, 0  ;;  %v1155_v60 = vld [vmem:[#allocation4 + $0x10] sm:$0xff] (!%p1632_p1)  ;;  %v1182_v14 = vld [vmem:[#allocation5] sm:$0xff] (!%p1632_p1) }
 0x3a2   : > { %1729 = vmatmul.mubr.msk.bf16.vlgmr.msra.gmra.mrb[0].mxu0 %vm893_vm7, %v881_v28  ;;  %1735 = vmatmul.mubr.msk.bf16.vlgmr.msra.gmra.mrb[0].mxu1 %vm893_vm7, %v882_v29 }
 0x3a3   : > { %1739 = vmatpush3.bf16.xpose.msra.mxu0 %v990_v30  ;;  %1745 = vmatpush3.bf16.xpose.msra.mxu1 %v1036_v31  ;;  %v891_v30 = vld [vmem:[%s2623_s5 + $0x8] sm:$0xf] }
 0x3a4   : > { %1740 = vmatprep.mubr.msk.bf16.mxu0 %vm2239_vm8, %v2238_v23  ;;  %1746 = vmatprep.mubr.msk.bf16.mxu1 %vm2239_vm8, %v2238_v23  ;;  %v1311_v34 = vsel %vm1217_vm11, %v891_v30, 0 }
 0x3a5   : > { %1750 = vmatprep.subr.bf16.mxu0 %v2238_v23  ;;  %1756 = vmatprep.subr.bf16.mxu1 %v2238_v23 }
 0x3aa   : > { %1741 = vmatmul.mubr.msk.bf16.vlgmr.msra.gmra.mrb[4].mxu0 %vm893_vm7, %v883_v32  ;;  %1747 = vmatmul.mubr.msk.bf16.vlgmr.msra.gmra.mrb[4].mxu1 %vm893_vm7, %v884_v33 }
 0x3ab   : > { %1752 = vmatprep.mubr.msk.bf16.mxu0 %vm2239_vm8, %v2238_v23  ;;  %1758 = vmatprep.mubr.msk.bf16.mxu1 %vm2239_vm8, %v2238_v23 }
 0x3ac   : > { %1751 = vmatpush3.bf16.msra.mxu0 %v1219_v15  ;;  %1757 = vmatpush3.bf16.msra.mxu1 %v1265_v17  ;;  %v1183_v17 = vld [vmem:[#allocation5 + $0x8] sm:$0xff] }
 0x3ad   : > { %1762 = vmatprep.subr.bf16.mxu0 %v2238_v23  ;;  %1768 = vmatprep.subr.bf16.mxu1 %v2238_v23 }
 0x475   : > { %v934_v36 = vpop.f32.mrb[0].mxu0  ;;  %v980_v37 = vpop.f32.mrb[0].mxu1 }
 0x476   : > { %v2798_v38 = vsel %vm1082_vm9, %v934_v36, -1e+30  ;;  %v1730_v39 = vpop.f32.mrb[1].mxu0  ;;  %v2801_v40 = vsel %vm1082_vm9, %v980_v37, -1e+30  ;;  %v1736_v41 = vpop.f32.mrb[1].mxu1 }
 0x477   : > { %v937_v42 = vpop.f32.mrb[2].mxu0  ;;  %v1093_v43 = vsel %vm893_vm7, %v2798_v38, -inf  ;;  %v983_v44 = vpop.f32.mrb[2].mxu1  ;;  %v1096_v47 = vsel %vm893_vm7, %v2801_v40, -inf  ;;  %v1357_v39 = vsel %vm1217_vm11, %v892_v35, 0 }
 0x478   : > { %1094 = vmax.xlane.f32.xlu0 %v1093_v43  ;;  %v1731_v45 = vpop.f32.mrb[3].mxu0  ;;  %v1737_v46 = vpop.f32.mrb[3].mxu1 }
 0x47c   : > { %1097 = vmax.xlane.f32.xlu0 %v1096_v47 }
 0x47d   : > { %v1026_v48 = vpop.f32.mrb[4].mxu0  ;;  %v1072_v49 = vpop.f32.mrb[4].mxu1 }
 0x47e   : > { %v1087_v50 = vsel %vm1082_vm9, %v1026_v48, -1e+30  ;;  %v1742_v51 = vpop.f32.mrb[5].mxu0  ;;  %v2809_v52 = vsel %vm1082_vm9, %v1072_v49, -1e+30  ;;  %v1748_v53 = vpop.f32.mrb[5].mxu1 }
 0x47f   : > { %v1029_v54 = vpop.f32.mrb[6].mxu0  ;;  %v1099_v55 = vsel %vm893_vm7, %v1087_v50, -inf  ;;  %v1075_v56 = vpop.f32.mrb[6].mxu1  ;;  %v1102_v59 = vsel %vm893_vm7, %v2809_v52, -inf  ;;  %v1153_v53 = vld [vmem:[#allocation4] sm:$0xff] }
 0x480   : > { %1100 = vmax.xlane.f32.xlu1 %v1099_v55  ;;  %v1743_v57 = vpop.f32.mrb[7].mxu0  ;;  %v1749_v58 = vpop.f32.mrb[7].mxu1  ;;  %v1154_v56 = vld [vmem:[#allocation4 + $0x8] sm:$0xff] }
 0x484   : > { %1103 = vmax.xlane.f32.xlu1 %v1102_v59 }
 0x505   : > { %v1095_v62 = vpop.xlane.xlu0 %1094 }
 0x506   : > { %v2817_v63 = vmax.f32 %v2814_v61, %v1095_v62 }
 0x508   : > { %v1109_v1 = vsub.f32 %v2814_v61, %v2817_v63  ;;  %1407 = vst.msk [vmem:[#allocation3] sm:$0xff] %vm1177_vm10, %v2817_v63  ;;  %1123 = vperm.xlu0 %1948, %v2817_v63  }
 0x509   : > { %v1098_v2 = vpop.xlane.xlu0 %1097 }
 0x50a   : > { %v2827_v3 = vmax.f32 %v2819_v0, %v1098_v2  ;;  %v1113_v47 = vmul.f32 1.442695, %v1109_v1 }
 0x50c   : > { %v1110_v5 = vsub.f32 %v2819_v0, %v2827_v3  ;;  %1408 = vst.msk [vmem:[#allocation3 + $0x8] sm:$0xff] %vm1177_vm10, %v2827_v3  ;;  %1128 = vperm.xlu1 %1949, %v2827_v3   ;;  %v1156_v0 = vld [vmem:[#allocation4 + $0x18] sm:$0xff] }
 0x50d   : > { %v1101_v6 = vpop.xlane.xlu1 %1100 }
 0x50e   : > { %v2837_v7 = vmax.f32 %v2829_v4, %v1101_v6  ;;  %v1115_v44 = vmul.f32 1.442695, %v1110_v5 }
 0x510   : > { %v1111_v9 = vsub.f32 %v2829_v4, %v2837_v7  ;;  %1409 = vst.msk [vmem:[#allocation3 + $0x10] sm:$0xff] %vm1177_vm10, %v2837_v7  ;;  %1133 = vperm.xlu1 %1949, %v2837_v7  }
 0x511   : > { %v1104_v10 = vpop.xlane.xlu1 %1103 }
 0x512   : > { %v2847_v11 = vmax.f32 %v2839_v8, %v1104_v10 }
 0x514   : > { %v1112_v13 = vsub.f32 %v2839_v8, %v2847_v11  ;;  %1410 = vst.msk [vmem:[#allocation3 + $0x18] sm:$0xff] %vm1177_vm10, %v2847_v11  ;;  %1138 = vperm.xlu1 %1949, %v2847_v11  }
 0x516   : > { %v1119_v48 = vmul.f32 1.442695, %v1112_v13 }
 0x587   : > { %v1124_v18 = vpop.permute.xlu0 %1123 }
 0x588   : > { %v1141_v19 = vsub.f32 %v2798_v38, %v1124_v18 }
 0x58a   : > { %v1145_v20 = vmul.f32 1.442695, %v1141_v19 }
 0x58b   : > { %v1129_v21 = vpop.permute.xlu1 %1128 }
 0x58c   : > { %1950 = vpow2.f32 %v1145_v20  ;;  %v1142_v22 = vsub.f32 %v2801_v40, %v1129_v21 }
 0x58e   : > { %v1147_v24 = vmul.f32 1.442695, %v1142_v22 }
 0x58f   : > { %v1134_v25 = vpop.permute.xlu1 %1133 }
 0x590   : > { %1952 = vpow2.f32 %v1147_v24  ;;  %v1143_v26 = vsub.f32 %v1087_v50, %v1134_v25 }
 0x592   : > { %v1149_v27 = vmul.f32 1.442695, %v1143_v26 }
 0x593   : > { %v1139_v28 = vpop.permute.xlu1 %1138 }
 0x594   : > { %1954 = vpow2.f32 %v1149_v27  ;;  %v1144_v29 = vsub.f32 %v2809_v52, %v1139_v28  ;;  %v1184_v27 = vld [vmem:[#allocation5 + $0x10] sm:$0xff] }
 0x596   : > { %v1951_v31 = vpop.eup %1950  ;;  %v1151_v32 = vmul.f32 1.442695, %v1144_v29 }
 0x597   : > { %v1161_v33 = vsel %vm893_vm7, %v1951_v31, 0.0  ;;  %v1210_v12 = vpack.c.bf16 %v1951_v31, %v1951_v31 }
 0x598   : > { %1956 = vpow2.f32 %v1151_v32  ;;  %1162 = vadd.xlane.f32.xlu1 %v1161_v33 }
 0x599   : > { %1753 = vmatmul.mubr.msk.bf16.vlgmr.msra.gmra.mrb[8].mxu0 %vm893_vm7, %v1210_v12  ;;  %1958 = vpow2.f32 %v1115_v44  ;;  %v1185_v12 = vld [vmem:[#allocation5 + $0x18] sm:$0xff] }
 0x59a   : > { %v1953_v36 = vpop.eup %1952  ;;  %1763 = vmatpush3.bf16.msra.mxu0 %v1311_v34  ;;  %1764 = vmatprep.mubr.msk.bf16.mxu0 %vm2239_vm8, %v2238_v23  ;;  %1960 = vpow2.f32 %v1113_v47 }
 0x59b   : > { %v1164_v37 = vsel %vm893_vm7, %v1953_v36, 0.0  ;;  %v1211_v38 = vpack.c.bf16 %v1953_v36, %v1953_v36 }
 0x59c   : > { %1165 = vadd.xlane.f32.xlu0 %v1164_v37 }
 0x59d   : > { %1759 = vmatmul.mubr.msk.bf16.vlgmr.msra.gmra.mrb[8].mxu1 %vm893_vm7, %v1211_v38 }
 0x59e   : > { %v1955_v40 = vpop.eup %1954  ;;  %1769 = vmatpush3.bf16.msra.mxu1 %v1357_v39  ;;  %1770 = vmatprep.mubr.msk.bf16.mxu1 %vm2239_vm8, %v2238_v23  ;;  %v1117_v23 = vmul.f32 1.442695, %v1111_v9 }
 0x59f   : > { %v1167_v41 = vsel %vm893_vm7, %v1955_v40, 0.0  ;;  %v1212_v42 = vpack.c.bf16 %v1955_v40, %v1955_v40 }
 0x5a0   : > { %1168 = vadd.xlane.f32.xlu1 %v1167_v41  ;;  %1962 = vpow2.f32 %v1117_v23 }
 0x5a1   : > { %1765 = vmatmul.mubr.msk.bf16.vlgmr.msra.gmra.mrb[12].mxu0 %vm893_vm7, %v1212_v42  ;;  %1964 = vpow2.f32 %v1119_v48 }
 0x5a2   : > { %v1957_v43 = vpop.eup %1956 }
 0x5a3   : > { %v1170_v45 = vsel %vm893_vm7, %v1957_v43, 0.0  ;;  %v1213_v46 = vpack.c.bf16 %v1957_v43, %v1957_v43  ;;  %v1959_v49 = vpop.eup %1958 }
 0x5a4   : > { %1171 = vadd.xlane.f32.xlu1 %v1170_v45  ;;  %v1961_v50 = vpop.eup %1960  ;;  %v1158_v58 = vmul.f32 %v1959_v49, %v1154_v56 }
 0x5a5   : > { %1771 = vmatmul.mubr.msk.bf16.vlgmr.msra.gmra.mrb[12].mxu1 %vm893_vm7, %v1213_v46  ;;  %v1157_v54 = vmul.f32 %v1961_v50, %v1153_v53 }
 0x5aa   : > { %v1963_v51 = vpop.eup %1962 }
 0x5ab   : > { %v1965_v52 = vpop.eup %1964  ;;  %v1159_v62 = vmul.f32 %v1963_v51, %v1155_v60 }
 0x5ac   : > { %v1160_v3 = vmul.f32 %v1965_v52, %v1156_v0 }
 0x5b2   : > { %1193 = vperm.xlu0 %1948, %v1959_v49  }
 0x5b5   : > { %1188 = vperm.xlu1 %1949, %v1961_v50  }
 0x5b9   : > { %1198 = vperm.xlu1 %1949, %v1963_v51  }
 0x5bd   : > { %1203 = vperm.xlu1 %1949, %v1965_v52  }
 0x625   : > { %v1163_v55 = vpop.xlane.xlu1 %1162 }
 0x626   : > { %v1173_v57 = vadd.f32 %v1163_v55, %v1157_v54 }
 0x628   : > { %1178 = vst.msk [vmem:[#allocation4] sm:$0xff] %vm1177_vm10, %v1173_v57 }
 0x629   : > { %v1166_v59 = vpop.xlane.xlu0 %1165 }
 0x62a   : > { %v1174_v61 = vadd.f32 %v1166_v59, %v1158_v58 }
 0x62c   : > { %1179 = vst.msk [vmem:[#allocation4 + $0x8] sm:$0xff] %vm1177_vm10, %v1174_v61 }
 0x62d   : > { %v1169_v63 = vpop.xlane.xlu1 %1168 }
 0x62e   : > { %v1175_v1 = vadd.f32 %v1169_v63, %v1159_v62 }
 0x62f   : > { %v1411_v2 = vld [vmem:[#allocation4] sm:$0xff] }
 0x630   : > { %1180 = vst.msk [vmem:[#allocation4 + $0x10] sm:$0xff] %vm1177_vm10, %v1175_v1  ;;  %1966 = vrcp.f32 %v1411_v2 }
 0x631   : > { %v1172_v4 = vpop.xlane.xlu1 %1171  ;;  %v1194_v18 = vpop.permute.xlu0 %1193 }
 0x632   : > { %v1176_v5 = vadd.f32 %v1172_v4, %v1160_v3  ;;  %v1207_v25 = vmul.f32 %v1194_v18, %v1183_v17 }
 0x633   : > { %v1412_v6 = vld [vmem:[#allocation4 + $0x8] sm:$0xff] }
 0x634   : > { %1181 = vst.msk [vmem:[#allocation4 + $0x18] sm:$0xff] %vm1177_vm10, %v1176_v5  ;;  %1968 = vrcp.f32 %v1412_v6 }
 0x635   : > { %v1189_v15 = vpop.permute.xlu1 %1188 }
 0x636   : > { %v1206_v16 = vmul.f32 %v1189_v15, %v1182_v14 }
 0x637   : > { %v1413_v7 = vld [vmem:[#allocation4 + $0x10] sm:$0xff] }
 0x638   : > { %1970 = vrcp.f32 %v1413_v7 }
 0x639   : > { %v1199_v22 = vpop.permute.xlu1 %1198 }
 0x63a   : > { %v1967_v8 = vpop.eup %1966  ;;  %v1208_v32 = vmul.f32 %v1199_v22, %v1184_v27 }
 0x63b   : > { %1425 = vperm.xlu1 %1949, %v1967_v8   ;;  %v1414_v9 = vld [vmem:[#allocation4 + $0x18] sm:$0xff] }
 0x63c   : > { %1972 = vrcp.f32 %v1414_v9 }
 0x63d   : > { %v1204_v34 = vpop.permute.xlu1 %1203 }
 0x63e   : > { %v1969_v10 = vpop.eup %1968  ;;  %v1209_v39 = vmul.f32 %v1204_v34, %v1185_v12 }
 0x63f   : > { %1430 = vperm.xlu0 %1948, %v1969_v10  }
 0x642   : > { %v1971_v11 = vpop.eup %1970 }
 0x643   : > { %1435 = vperm.xlu1 %1949, %v1971_v11  }
 0x646   : > { %v1973_v13 = vpop.eup %1972 }
 0x647   : > { %1440 = vperm.xlu0 %1948, %v1973_v13  }
 0x66c   : > { %v1255_v19 = vpop.f32.mrb[8].mxu0 }
 0x66d   : > { %v1399_v20 = vadd.f32 %v1255_v19, %v1206_v16  ;;  %v1754_v21 = vpop.f32.mrb[9].mxu0 }
 0x66e   : > { %v1258_v24 = vpop.f32.mrb[10].mxu0 }
 0x66f   : > { %1403 = vst.msk [vmem:[#allocation5] sm:$0xff] %vm893_vm7, %v1399_v20  ;;  %v1755_v26 = vpop.f32.mrb[11].mxu0 }
 0x670   : > { %v1301_v28 = vpop.f32.mrb[8].mxu1 }
 0x671   : > { %v1400_v29 = vadd.f32 %v1301_v28, %v1207_v25  ;;  %v1760_v30 = vpop.f32.mrb[9].mxu1 }
 0x672   : > { %v1304_v31 = vpop.f32.mrb[10].mxu1 }
 0x673   : > { %1404 = vst.msk [vmem:[#allocation5 + $0x8] sm:$0xff] %vm893_vm7, %v1400_v29  ;;  %v1761_v33 = vpop.f32.mrb[11].mxu1 }
 0x674   : > { %v1347_v35 = vpop.f32.mrb[12].mxu0 }
 0x675   : > { %v1401_v36 = vadd.f32 %v1347_v35, %v1208_v32  ;;  %v1766_v37 = vpop.f32.mrb[13].mxu0 }
 0x676   : > { %v1350_v38 = vpop.f32.mrb[14].mxu0  ;;  %v1419_v47 = vld [vmem:[#allocation5] sm:$0xff] }
 0x677   : > { %1405 = vst.msk [vmem:[#allocation5 + $0x10] sm:$0xff] %vm893_vm7, %v1401_v36  ;;  %v1767_v40 = vpop.f32.mrb[15].mxu0 }
 0x678   : > { %v1393_v41 = vpop.f32.mrb[12].mxu1 }
 0x679   : > { %v1402_v42 = vadd.f32 %v1393_v41, %v1209_v39  ;;  %v1772_v43 = vpop.f32.mrb[13].mxu1 }
 0x67a   : > { %v1396_v44 = vpop.f32.mrb[14].mxu1  ;;  %v1420_v49 = vld [vmem:[#allocation5 + $0x8] sm:$0xff] }
 0x67b   : > { %1406 = vst.msk [vmem:[#allocation5 + $0x18] sm:$0xff] %vm893_vm7, %v1402_v42  ;;  %v1773_v45 = vpop.f32.mrb[15].mxu1 }
 0x67e   : > { %v1421_v54 = vld [vmem:[#allocation5 + $0x10] sm:$0xff] }
 0x682   : > { %v1422_v58 = vld [vmem:[#allocation5 + $0x18] sm:$0xff] }
 0x6ba   : > { %v1426_v46 = vpop.permute.xlu1 %1425 }
 0x6bb   : > { %v1443_v23 = vmul.f32 %v1426_v46, %v1419_v47 }
 0x6bd   : > { %v1447_v48 = vpack.c.bf16 %v1443_v23, %v1443_v23 }
 0x6be   : > { %v1431_v50 = vpop.permute.xlu0 %1430 }
 0x6bf   : > { %1452 = vst.msk [vmem:[%s2636_s19] sm:$0xf] %vm1451_vm12, %v1447_v48  ;;  %v1444_v51 = vmul.f32 %v1431_v50, %v1420_v49 }
 0x6c1   : > { %v1448_v52 = vpack.c.bf16 %v1444_v51, %v1444_v51 }
 0x6c2   : > { %v1436_v53 = vpop.permute.xlu1 %1435 }
 0x6c3   : > { %1453 = vst.msk [vmem:[%s2636_s19 + $0x4] sm:$0xf] %vm1451_vm12, %v1448_v52  ;;  %v1445_v55 = vmul.f32 %v1436_v53, %v1421_v54 }
 0x6c5   : > { %v1449_v56 = vpack.c.bf16 %v1445_v55, %v1445_v55 }
 0x6c6   : > { %v1441_v57 = vpop.permute.xlu0 %1440 }
 0x6c7   : > { %1454 = vst.msk [vmem:[%s2636_s19 + $0x8] sm:$0xf] %vm1451_vm12, %v1449_v56  ;;  %v1446_v59 = vmul.f32 %v1441_v57, %v1422_v58 }
 0x6c9   : > { %v1450_v60 = vpack.c.bf16 %v1446_v59, %v1446_v59 }
 0x6cb   : > { %1455 = vst.msk [vmem:[%s2636_s19 + $0xc] sm:$0xf] %vm1451_vm12, %v1450_v60 }
 0x6cc PF: > { %s1464_s27 = sld [smem:[#allocation7]]  ;;  %s3058_s2 = sld [smem:[#allocation23_spill]] }
 0x6cd   : > { %s3060_s8 = sld [smem:[#allocation28_spill]]  ;;  %s1472_s15 = sshll.u32 %s2636_s19, 4  ;;  %s2903_s15 = int_to_ptr.vmem [resolvable:$true] %s1472_s15 }
 0x6ce   : > { %s3061_s16 = sld [smem:[#allocation31_spill]]  ;;  %s2912_s3 = scalar_lea.sflag [#allocation11], %s308_s13 }
 0x6cf   : > { %s2064_s5 = scalar_lea.vmem %s2903_s15, 256  ;;  %s2241_s10 = smov [#allocation15]  }
 0x6d0   : > { %p2065_p6 = scmp.ne.s32.totalorder %s2903_s15, %s2064_s5  ;;  %s2068_s14 = sshll.u32 %s2241_s10, 4  ;;  %s2069_s14 = int_to_ptr.vmem [resolvable:$false] %s2068_s14 }
 0x6d1   : > { %s2070_s11 = scalar_lea.vmem %s2069_s14, 512  ;;  %p2071_p2 = scmp.lt.s32.totalorder %s2903_s15, %s2069_s14 }
 0x6d2   : > { %s1642_s20 = sshll.u32 %s3058_s2, 2  ;;  %p2072_p8 = scmp.lt.s32.totalorder %s2070_s11, %s2064_s5 }
 0x6d3   : > { %s1469_s25 = sadd.s32 %s1642_s20, %s1464_s27  ;;  %p3062_p11 = scmp.ne.s32.totalorder %s3060_s8, 0 }
 0x6d4   : > { %s1643_s21 = sshll.u32 %s1469_s25, 6  ;;  %p2073_p9 = por %p2072_p8, %p2071_p2 }
 0x6d5   : > { %s2908_s23 = scalar_lea.hbm %s3061_s16, %s1643_s21  ;;  %p2066_p0 = pnand %p2065_p6, %p3062_p11 }
 0x6d7   : > { %p2067_p10 = pneg %p2066_p0 }
 0x6d9   : > { %p2074_p13 = pnand %p2073_p9, %p2067_p10 }
 0x6db   : > { %2077 = shalt.err (!%p2074_p13)
}
 0x6dc   : > { %s2078_s13 = scalar_lea.hbm %s2908_s23, 256  ;;  %s2082_s27 = scalar_lea.hbm %s3061_s16, 512 }
 0x6dd   : > { %p2079_p5 = scmp.ne.s32.totalorder %s2908_s23, %s2078_s13  ;;  %p2083_p4 = scmp.lt.u32.totalorder %s2908_s23, %s3061_s16 }
 0x6de   : > { %p2084_p12 = scmp.lt.u32.totalorder %s2082_s27, %s2078_s13  ;;  %p2086_p6 = scmp.lt.u32.totalorder %s2078_s13, %s2908_s23 }
 0x6df   : > { %p2080_p3 = pnand %p2079_p5, %p3062_p11 }
 0x6e0   : > { %p2085_p1 = por %p2084_p12, %p2083_p4 }
 0x6e1   : > { %p2081_p7 = pneg %p2080_p3 }
 0x6e2   : > { %p2087_p0 = por %p2086_p6, %p2085_p1 }
 0x6e4   : > { %p2088_p10 = pnand %p2087_p0, %p2081_p7 }
 0x6e6   : > { %2091 = shalt.err (!%p2088_p10)
}
 0x6e7   : > { %s2242_s20 = smov 64   ;;  %s2243_s25 = smov 4  }
 0x6e8   : > { %1780 = dma.vmem_to_hbm [thread:$0]  (%p3062_p11), %s2903_s15, 256, %s2908_s23, %s2912_s3, %s2242_s20, %s2242_s20, %s2243_s25  }
 0x6e9 PF: > { %s3063_s21 = sld [smem:[#allocation20_spill]]  ;;  %p3064_p2 = scmp.ne.s32.totalorder %s3034_s12, 0 }
 0x6ea   : > { %p3065_p8 = scmp.ge.s32.totalorder %s2226_s9, 2 }
 0x6ec   : > { %p1793_p9 = pnand %p3065_p8, %p3064_p2 }
 0x6ef   : > { %s1487_s22 = sand.u32 1, %s3063_s21  }
 0x6f0   : > { %s1488_s7 = scalar_lea.sflag [#allocation11], %s1487_s22 }
 0x6f1   : > { %2165 = dma.done.wait (!%p1793_p9), %s1488_s7, 256  }
 0x6f2   : > { %2167 = vsyncadd (!%p1793_p9), %s1488_s7, 4294967040  ;;  %s26_s9 = sadd.s32 1, %s2226_s9   ;;  %s3067_s22 = sld [smem:[#allocation21_spill]] }
 0x6f3   : > { %p2942_p13 = scmp.ge.s32.totalorder %s26_s9, 4   ;;  %s3068_s23 = sld [smem:[#allocation22_spill]] }
 0x6f4   : > { %s3069_s24 = sld [smem:[#allocation26_spill]]  ;;  %s3070_s12 = sld [smem:[#allocation27_spill]] }
 0x6f5   : > { %s3071_s7 = sld [smem:[#allocation24_spill]]  ;;  %s3072_s8 = sld [smem:[#allocation25_spill]] }
 0x6f6   : > { %s3073_s25 = smov %s2186_s26  ;;  %s3074_s26 = smov %s2190_s0 }
 0x6f7   : > { %s3075_s0 = smov %s2548_s29  ;;  %s3076_s27 = smov %s2198_s1 }
 0x6f8   : > { %s3077_s1 = smov %s2202_s28  ;;  %s3079_s29 = smov %s2210_s30 }
 0x6f9   : > { %s3080_s30 = smov %s2214_s6  ;;  %s3081_s6 = smov %s2482_s17 }
 0x6fa   : > { %s3078_s28 = smov %s3070_s12  ;;  %25 = sbr.rel (!%p2942_p13) target bundleno = 19 (0x13), region = 113 }
 0x701   :  { %1493 = vsyncpa [#allocation10], 1 }
 0x702   :  { %1495 = vsyncpa [#allocation10 + $0x1], 1 }
 0x703   :  { %1496 = vsyncpa [#allocation13], 1 }
 0x704   :  { %1498 = vsyncpa [#allocation13 + $0x1], 1 }
 0x705   :  { %1499 = vsyncpa [#allocation11], 1 }
 0x706   :  { %1501 = vsyncpa [#allocation11 + $0x1], 1 }

</bundles_post_ra>
